<compile_context>
chip_gen: v7x
topology: tpu7x:2x2x1
jax: 0.10.0
libtpu: 0.0.40
codegen_flags: <defaults>
</compile_context>

<pallas_src>
import functools
import math

import jax
import jax.numpy as jnp
from jax.experimental import pallas as pl
from jax.experimental.pallas import tpu as pltpu


# ----------------------------- in-kernel math helpers -----------------------------

def _sigmoid(x):
    # exp -> EUP, approx reciprocal -> EUP; no VPU divide.
    return pl.reciprocal(1.0 + jnp.exp(-x), approx=True)


def _silu(x):
    return x * _sigmoid(x)


def _log_sigmoid(x):
    # numerically stable logsigmoid (f32)
    return jnp.minimum(x, 0.0) - jnp.log(1.0 + jnp.exp(-jnp.abs(x)))


def _layernorm(x, w, eps=1e-5):
    # F.layer_norm semantics: biased variance over last axis, weight only (no bias).
    mu = jnp.mean(x, axis=-1, keepdims=True)
    xc = x - mu
    var = jnp.mean(xc * xc, axis=-1, keepdims=True)
    return xc * jax.lax.rsqrt(var + eps) * w


def _shift_down(x, shift, row_ids):
    # y[i] = x[i - shift] for i >= shift, else 0  (causal shift along sublanes, XLU)
    rolled = pltpu.roll(x, shift, 0)
    return jnp.where(row_ids >= shift, rolled, 0.0)


# ----------------------------- fused mLSTM block kernel -----------------------------

def mlstm_block_kernel(x_ref, ln1_w_ref, w_up_ref, conv_w_ref, conv_b_ref,
                       wqk_ref, wv_ref, b_gate_ref, outnorm_w_ref, skip_ref,
                       w_down_ref, post_w_ref, out_ref, hbuf_ref,
                       *, S, E, inner, nh, dh, ksize, apply_post_norm):
    f32 = jnp.float32
    bf16 = jnp.bfloat16

    x = x_ref[0]                                             # (S, E) f32 residual input

    # ---- pre-block LayerNorm (xlstm_norm, weight-only) ----
    y = _layernorm(x, ln1_w_ref[...])                        # (S, E)

    # ---- up projection, split into mLSTM branch and output-gate branch ----
    up = jnp.dot(y.astype(bf16), w_up_ref[...],
                 preferred_element_type=f32)                 # (S, 2*inner)
    x_m = up[:, :inner]                                      # (S, inner)
    z = up[:, inner:]                                        # (S, inner)

    row_ids = jax.lax.broadcasted_iota(jnp.int32, (S, 1), 0)  # hoisted sublane iota

    # ---- causal depthwise conv1d via XLU rolls + masks (no concat copies) ----
    conv = x_m * conv_w_ref[ksize - 1:ksize, :] + conv_b_ref[...]
    for shift in range(1, ksize):
        conv = conv + (_shift_down(x_m, shift, row_ids)
                       * conv_w_ref[ksize - 1 - shift:ksize - shift, :])
    conv_act = _silu(conv)                                   # (S, inner)

    # ---- fused headwise q/k (+ folded gate columns) and v (+ folded gate columns) ----
    qkg = jnp.dot(conv_act.astype(bf16), wqk_ref[...],
                  preferred_element_type=f32)                # (S, 2*inner + 2*nh)
    vg = jnp.dot(x_m.astype(bf16), wv_ref[...],
                 preferred_element_type=f32)                 # (S, inner + 2*nh)
    q = qkg[:, :inner]
    k = qkg[:, inner:2 * inner]
    v = vg[:, :inner]
    gates = qkg[:, 2 * inner:] + vg[:, inner:] + b_gate_ref[...]   # (S, 2*nh)
    ig = gates[:, :nh]                                       # input-gate preacts
    fg = gates[:, nh:]                                       # forget-gate preacts

    # ---- forget-gate inclusive cumsum for ALL heads (log-depth scan, XLU) ----
    cs = _log_sigmoid(fg)                                    # (S, nh)
    shift = 1
    while shift < S:
        cs = cs + jnp.where(row_ids >= shift, pltpu.roll(cs, shift, 0), 0.0)
        shift *= 2

    # hoisted column-broadcast forms for all heads (one transpose instead of per-head reshapes)
    cs_t = jnp.transpose(cs)                                 # (nh, S)
    ig_t = jnp.transpose(ig)                                 # (nh, S)

    row = jax.lax.broadcasted_iota(jnp.int32, (S, S), 0)
    col = jax.lax.broadcasted_iota(jnp.int32, (S, S), 1)
    ltr = row >= col
    neg_big = jnp.float32(-1e30)                             # causal mask value (f32)
    inv_sqrt_dh = 1.0 / math.sqrt(dh)
    onw = outnorm_w_ref[...]                                 # (1, inner), hoisted

    for h in range(nh):
        qh = q[:, h * dh:(h + 1) * dh]                       # (S, dh)
        kh = k[:, h * dh:(h + 1) * dh] * inv_sqrt_dh
        vh = v[:, h * dh:(h + 1) * dh]
        cs_col = cs[:, h:h + 1]                              # (S, 1) inclusive cumsum
        cs_row = cs_t[h:h + 1, :]                            # (1, S)
        ig_row = ig_t[h:h + 1, :]                            # (1, S)

        # D_log[i, j] = sum_{t=j+1..i} logsig(f_t) + i_j  for i >= j
        log_d = jnp.where(ltr, cs_col - cs_row, neg_big) + ig_row

        # row-wise stabilization; clamp so exp(-max_log_d) stays finite in f32
        max_log_d = jnp.maximum(jnp.max(log_d, axis=-1, keepdims=True), -80.0)
        d_mat = jnp.exp(log_d - max_log_d)

        qk = jax.lax.dot_general(qh.astype(bf16), kh.astype(bf16),
                                 (((1,), (1,)), ((), ())),
                                 preferred_element_type=f32)  # (S, S)
        c_mat = qk * d_mat
        normalizer = jnp.maximum(jnp.abs(jnp.sum(c_mat, axis=-1, keepdims=True)),
                                 jnp.exp(-max_log_d))
        c_norm = c_mat * pl.reciprocal(normalizer + 1e-6, approx=True)
        h_tilde = jnp.dot(c_norm.astype(bf16), vh.astype(bf16),
                          preferred_element_type=f32)         # (S, dh)

        # per-head GroupNorm (MultiHeadLayerNorm): normalize over dh, scale by weight slice
        mu = jnp.mean(h_tilde, axis=-1, keepdims=True)
        hc = h_tilde - mu
        var = jnp.mean(hc * hc, axis=-1, keepdims=True)
        hbuf_ref[:, h * dh:(h + 1) * dh] = (
            hc * jax.lax.rsqrt(var + 1e-5) * onw[:, h * dh:(h + 1) * dh])

    h_cat = hbuf_ref[...]                                    # (S, inner)
    h_state = (h_cat + skip_ref[...] * conv_act) * _silu(z)  # skip + output gate

    out = x + jnp.dot(h_state.astype(bf16), w_down_ref[...],
                      preferred_element_type=f32)            # residual
    if apply_post_norm:
        out = _layernorm(out, post_w_ref[...])               # fused post_blocks_norm
    out_ref[0] = out


# ----------------------------- wrapper / weight preparation -----------------------------

def prepare_block_params(p):
    """Fold ig/fg gate projections into augmented q/k and v weights; pre-cast the
    MXU weights to bf16 (kernel accumulates in f32)."""
    inner = p["w_down"].shape[0]
    bf16 = jnp.bfloat16
    w_ig, w_fg = p["w_ig"], p["w_fg"]                        # (3*inner, nh)

    # gate contribution through conv_act (q/k branches) and through x_m (v branch)
    wg_c = jnp.concatenate(
        [p["wq"] @ w_ig[:inner] + p["wk"] @ w_ig[inner:2 * inner],
         p["wq"] @ w_fg[:inner] + p["wk"] @ w_fg[inner:2 * inner]], axis=1)   # (inner, 2*nh)
    wg_x = jnp.concatenate(
        [p["wv"] @ w_ig[2 * inner:], p["wv"] @ w_fg[2 * inner:]], axis=1)     # (inner, 2*nh)

    return {
        "ln1_w": p["ln1_w"],
        "w_up": p["w_up"].astype(bf16),
        "conv_w": p["conv_w"],
        "conv_b": p["conv_b"],
        "wqk_aug": jnp.concatenate([p["wq"], p["wk"], wg_c], axis=1).astype(bf16),
        "wv_aug": jnp.concatenate([p["wv"], wg_x], axis=1).astype(bf16),
        "b_gate": jnp.concatenate([p["b_ig"], p["b_fg"]], axis=1),
        "outnorm_w": p["outnorm_w"],
        "skip": p["skip"],
        "w_down": p["w_down"].astype(bf16),
        "inner": inner,
        "nh": p["b_ig"].shape[1],
        "ksize": p["conv_w"].shape[0],
    }


def _rep_spec(arr):
    # Parameter stays at block (0, ..., 0) for every grid step (kept resident).
    nd = arr.ndim
    return pl.BlockSpec(arr.shape, lambda b, _nd=nd: (0,) * _nd)


def run_mlstm_block(x, pp, post_w, apply_post_norm):
    B, S, E = x.shape
    inner, nh, ksize = pp["inner"], pp["nh"], pp["ksize"]
    dh = inner // nh

    kernel = functools.partial(mlstm_block_kernel, S=S, E=E, inner=inner,
                               nh=nh, dh=dh, ksize=ksize,
                               apply_post_norm=apply_post_norm)

    params = [pp["ln1_w"], pp["w_up"], pp["conv_w"], pp["conv_b"], pp["wqk_aug"],
              pp["wv_aug"], pp["b_gate"], pp["outnorm_w"], pp["skip"],
              pp["w_down"], post_w]

    in_specs = ([pl.BlockSpec((1, S, E), lambda b: (b, 0, 0))]
                + [_rep_spec(a) for a in params])
    out_spec = pl.BlockSpec((1, S, E), lambda b: (b, 0, 0))

    return pl.pallas_call(
        kernel,
        out_shape=jax.ShapeDtypeStruct((B, S, E), jnp.float32),
        grid_spec=pltpu.PrefetchScalarGridSpec(
            num_scalar_prefetch=0, grid=(B,),
            in_specs=in_specs, out_specs=out_spec,
            scratch_shapes=[pltpu.VMEM((S, inner), jnp.float32)]),
        compiler_params=pltpu.CompilerParams(
            dimension_semantics=("parallel",),
            vmem_limit_bytes=64 * 1024 * 1024),
    )(x, *params)


def xlstm_block_stack_forward(x, block_params_list, post_norm_w):
    # state is None for the parallel backend; return_last_state=False -> plain tensor.
    prepped = [prepare_block_params(p) for p in block_params_list]
    n = len(prepped)
    for i, pp in enumerate(prepped):
        x = run_mlstm_block(x, pp, post_norm_w, apply_post_norm=(i == n - 1))
    return x


# ----------------------------- parameter init (deterministic, synthetic) -----------------------------

def init_block_params(key, E, inner, nh, ksize, qkv_block):
    keys = jax.random.split(key, 8)
    scale = 0.02
    n_qkv_heads = inner // qkv_block

    def block_diag_weight(k):
        blocks = scale * jax.random.normal(k, (n_qkv_heads, qkv_block, qkv_block), jnp.float32)
        return jax.scipy.linalg.block_diag(*[blocks[i] for i in range(n_qkv_heads)])

    return {
        # LayerNorm weight_proxy (residual_weight=True -> 1 + zeros = ones)
        "ln1_w": jnp.ones((1, E), jnp.float32),
        "w_up": scale * jax.random.normal(keys[0], (E, 2 * inner), jnp.float32),
        "conv_w": scale * jax.random.normal(keys[1], (ksize, inner), jnp.float32),
        "conv_b": jnp.zeros((1, inner), jnp.float32),
        "wq": block_diag_weight(keys[2]),
        "wk": block_diag_weight(keys[3]),
        "wv": block_diag_weight(keys[4]),
        "w_ig": scale * jax.random.normal(keys[5], (3 * inner, nh), jnp.float32),
        "b_ig": jnp.full((1, nh), -3.0, jnp.float32),
        "w_fg": scale * jax.random.normal(keys[6], (3 * inner, nh), jnp.float32),
        "b_fg": jnp.linspace(3.0, 6.0, nh, dtype=jnp.float32).reshape(1, nh),
        "outnorm_w": jnp.ones((1, inner), jnp.float32),
        "skip": jnp.ones((1, inner), jnp.float32),
        "w_down": scale * jax.random.normal(keys[7], (inner, E), jnp.float32),
    }


# ----------------------------- demo -----------------------------

if __name__ == "__main__":
    # small config: num_blocks=2, embedding_dim=32, context_length=8, batch=2
    # mLSTM layer: proj_factor=2 -> inner=64, num_heads=4 -> head_dim=16,
    # conv1d_kernel_size=4, qkv_proj_blocksize=4, bias=False, dropout=0
    B, S, E = 2, 8, 32
    NUM_BLOCKS = 2
    INNER = 2 * E
    NH = 4
    KSIZE = 4
    QKV_BLOCK = 4

    root = jax.random.PRNGKey(0)
    kx, *block_keys = jax.random.split(root, 1 + NUM_BLOCKS)

    x = jax.random.normal(kx, (B, S, E), jnp.float32)
    block_params_list = [init_block_params(bk, E, INNER, NH, KSIZE, QKV_BLOCK)
                         for bk in block_keys]
    post_norm_w = jnp.ones((1, E), jnp.float32)   # post_blocks_norm weight_proxy

    out = xlstm_block_stack_forward(x, block_params_list, post_norm_w)
    out = jax.block_until_ready(out)

    assert out.shape == (B, S, E)
    assert bool(jnp.all(jnp.isfinite(out)))
    # TODO(synk): chunkwise/recurrent backends (stateful `step`, state dict in/out)
    # are not implemented; only the parallel (stateless) forward path is covered.
    print("KERNEL_OK")
</pallas_src>

<mosaic_0001>
module attributes {stable_mosaic.version = 11 : i64} {
  func.func @mlstm_block_kernel(%arg0: i32, %arg1: memref<1x8x32xf32, #tpu.memory_space<vmem>>, %arg2: memref<1x32xf32, #tpu.memory_space<vmem>>, %arg3: memref<32x128xbf16, #tpu.memory_space<vmem>>, %arg4: memref<4x64xf32, #tpu.memory_space<vmem>>, %arg5: memref<1x64xf32, #tpu.memory_space<vmem>>, %arg6: memref<64x136xbf16, #tpu.memory_space<vmem>>, %arg7: memref<64x72xbf16, #tpu.memory_space<vmem>>, %arg8: memref<1x8xf32, #tpu.memory_space<vmem>>, %arg9: memref<1x64xf32, #tpu.memory_space<vmem>>, %arg10: memref<1x64xf32, #tpu.memory_space<vmem>>, %arg11: memref<64x32xbf16, #tpu.memory_space<vmem>>, %arg12: memref<1x32xf32, #tpu.memory_space<vmem>>, %arg13: memref<1x8x32xf32, #tpu.memory_space<vmem>>, %arg14: memref<8x64xf32, #tpu.memory_space<vmem>>) attributes {dimension_semantics = [#tpu.dimension_semantics<parallel>], iteration_bounds = array<i64: 2>, scalar_prefetch = 0 : i64, scratch_operands = 1 : i64, tpu.core_type = #tpu.core_type<tc>, window_params = [{transform_indices = @transform_0, window_bounds = array<i64: 1, 8, 32>}, {pipeline_mode = #tpu.pipeline_mode<synchronous>, transform_indices = @transform_1, window_bounds = array<i64: 1, 32>}, {pipeline_mode = #tpu.pipeline_mode<synchronous>, transform_indices = @transform_2, window_bounds = array<i64: 32, 128>}, {pipeline_mode = #tpu.pipeline_mode<synchronous>, transform_indices = @transform_3, window_bounds = array<i64: 4, 64>}, {pipeline_mode = #tpu.pipeline_mode<synchronous>, transform_indices = @transform_4, window_bounds = array<i64: 1, 64>}, {pipeline_mode = #tpu.pipeline_mode<synchronous>, transform_indices = @transform_5, window_bounds = array<i64: 64, 136>}, {pipeline_mode = #tpu.pipeline_mode<synchronous>, transform_indices = @transform_6, window_bounds = array<i64: 64, 72>}, {pipeline_mode = #tpu.pipeline_mode<synchronous>, transform_indices = @transform_7, window_bounds = array<i64: 1, 8>}, {pipeline_mode = #tpu.pipeline_mode<synchronous>, transform_indices = @transform_8, window_bounds = array<i64: 1, 64>}, {pipeline_mode = #tpu.pipeline_mode<synchronous>, transform_indices = @transform_9, window_bounds = array<i64: 1, 64>}, {pipeline_mode = #tpu.pipeline_mode<synchronous>, transform_indices = @transform_10, window_bounds = array<i64: 64, 32>}, {pipeline_mode = #tpu.pipeline_mode<synchronous>, transform_indices = @transform_11, window_bounds = array<i64: 1, 32>}, {transform_indices = @transform_12, window_bounds = array<i64: 1, 8, 32>}]} {
    %c0 = arith.constant 0 : index
    %c0_0 = arith.constant 0 : index
    %c0_1 = arith.constant 0 : index
    %0 = vector.load %arg1[%c0, %c0_0, %c0_1] : memref<1x8x32xf32, #tpu.memory_space<vmem>>, vector<1x8x32xf32>
    %1 = vector.shape_cast %0 : vector<1x8x32xf32> to vector<8x32xf32>
    %c0_2 = arith.constant 0 : index
    %c0_3 = arith.constant 0 : index
    %2 = vector.load %arg2[%c0_2, %c0_3] : memref<1x32xf32, #tpu.memory_space<vmem>>, vector<1x32xf32>
    %cst = arith.constant dense<0.000000e+00> : vector<8xf32>
    %3 = vector.multi_reduction <add>, %1, %cst [1] : vector<8x32xf32> to vector<8xf32>
    %4 = vector.shape_cast %3 : vector<8xf32> to vector<8x1xf32>
    %cst_4 = arith.constant 3.200000e+01 : f32
    %5 = vector.broadcast %cst_4 : f32 to vector<8x1xf32>
    %6 = arith.divf %4, %5 : vector<8x1xf32>
    %7 = vector.broadcast %6 : vector<8x1xf32> to vector<8x32xf32>
    %8 = arith.subf %1, %7 : vector<8x32xf32>
    %9 = arith.mulf %8, %8 : vector<8x32xf32>
    %cst_5 = arith.constant dense<0.000000e+00> : vector<8xf32>
    %10 = vector.multi_reduction <add>, %9, %cst_5 [1] : vector<8x32xf32> to vector<8xf32>
    %11 = vector.shape_cast %10 : vector<8xf32> to vector<8x1xf32>
    %cst_6 = arith.constant 3.200000e+01 : f32
    %12 = vector.broadcast %cst_6 : f32 to vector<8x1xf32>
    %13 = arith.divf %11, %12 : vector<8x1xf32>
    %cst_7 = arith.constant 9.99999974E-6 : f32
    %14 = vector.broadcast %cst_7 : f32 to vector<8x1xf32>
    %15 = arith.addf %13, %14 : vector<8x1xf32>
    %16 = math.rsqrt %15 : vector<8x1xf32>
    %17 = vector.broadcast %16 : vector<8x1xf32> to vector<8x32xf32>
    %18 = arith.mulf %8, %17 : vector<8x32xf32>
    %19 = vector.broadcast %2 : vector<1x32xf32> to vector<8x32xf32>
    %20 = arith.mulf %18, %19 : vector<8x32xf32>
    %21 = arith.truncf %20 : vector<8x32xf32> to vector<8x32xbf16>
    %c0_8 = arith.constant 0 : index
    %c0_9 = arith.constant 0 : index
    %22 = vector.load %arg3[%c0_8, %c0_9] : memref<32x128xbf16, #tpu.memory_space<vmem>>, vector<32x128xbf16>
    %cst_10 = arith.constant dense<0.000000e+00> : vector<8x128xf32>
    %23 = tpu.matmul %21, %22, %cst_10 {dimension_numbers = #tpu.dot_dimension_numbers<[1], [0], [0], [1], [0, 0, 1, 1], [], []>} : vector<8x32xbf16>, vector<32x128xbf16>, vector<8x128xf32> -> vector<8x128xf32>
    %24 = vector.extract_strided_slice %23 {offsets = [0, 0], sizes = [8, 64], strides = [1, 1]} : vector<8x128xf32> to vector<8x64xf32>
    %25 = vector.extract_strided_slice %23 {offsets = [0, 64], sizes = [8, 64], strides = [1, 1]} : vector<8x128xf32> to vector<8x64xf32>
    %26 = tpu.iota {dimensions = array<i32: 0>} : vector<8x1xi32>
    %c3 = arith.constant 3 : index
    %c0_11 = arith.constant 0 : index
    %27 = vector.load %arg4[%c3, %c0_11] : memref<4x64xf32, #tpu.memory_space<vmem>>, vector<1x64xf32>
    %28 = vector.broadcast %27 : vector<1x64xf32> to vector<8x64xf32>
    %29 = arith.mulf %24, %28 : vector<8x64xf32>
    %c0_12 = arith.constant 0 : index
    %c0_13 = arith.constant 0 : index
    %30 = vector.load %arg5[%c0_12, %c0_13] : memref<1x64xf32, #tpu.memory_space<vmem>>, vector<1x64xf32>
    %31 = vector.broadcast %30 : vector<1x64xf32> to vector<8x64xf32>
    %32 = arith.addf %29, %31 : vector<8x64xf32>
    %c1_i32 = arith.constant 1 : i32
    %33 = tpu.dynamic_rotate %24 by %c1_i32 dim 0 : vector<8x64xf32>, i32 -> vector<8x64xf32>
    %c1_i32_14 = arith.constant 1 : i32
    %34 = vector.broadcast %c1_i32_14 : i32 to vector<8x1xi32>
    %35 = arith.cmpi sge, %26, %34 : vector<8x1xi32>
    %cst_15 = arith.constant 0.000000e+00 : f32
    %36 = vector.shape_cast %35 : vector<8x1xi1> to vector<8x1xi1>
    %37 = vector.broadcast %36 : vector<8x1xi1> to vector<8x64xi1>
    %38 = vector.broadcast %cst_15 : f32 to vector<8x64xf32>
    %39 = arith.select %37, %33, %38 : vector<8x64xi1>, vector<8x64xf32>
    %c2 = arith.constant 2 : index
    %c0_16 = arith.constant 0 : index
    %40 = vector.load %arg4[%c2, %c0_16] : memref<4x64xf32, #tpu.memory_space<vmem>>, vector<1x64xf32>
    %41 = vector.broadcast %40 : vector<1x64xf32> to vector<8x64xf32>
    %42 = arith.mulf %39, %41 : vector<8x64xf32>
    %43 = arith.addf %32, %42 : vector<8x64xf32>
    %c2_i32 = arith.constant 2 : i32
    %44 = tpu.dynamic_rotate %24 by %c2_i32 dim 0 : vector<8x64xf32>, i32 -> vector<8x64xf32>
    %c2_i32_17 = arith.constant 2 : i32
    %45 = vector.broadcast %c2_i32_17 : i32 to vector<8x1xi32>
    %46 = arith.cmpi sge, %26, %45 : vector<8x1xi32>
    %cst_18 = arith.constant 0.000000e+00 : f32
    %47 = vector.shape_cast %46 : vector<8x1xi1> to vector<8x1xi1>
    %48 = vector.broadcast %47 : vector<8x1xi1> to vector<8x64xi1>
    %49 = vector.broadcast %cst_18 : f32 to vector<8x64xf32>
    %50 = arith.select %48, %44, %49 : vector<8x64xi1>, vector<8x64xf32>
    %c1 = arith.constant 1 : index
    %c0_19 = arith.constant 0 : index
    %51 = vector.load %arg4[%c1, %c0_19] : memref<4x64xf32, #tpu.memory_space<vmem>>, vector<1x64xf32>
    %52 = vector.broadcast %51 : vector<1x64xf32> to vector<8x64xf32>
    %53 = arith.mulf %50, %52 : vector<8x64xf32>
    %54 = arith.addf %43, %53 : vector<8x64xf32>
    %c3_i32 = arith.constant 3 : i32
    %55 = tpu.dynamic_rotate %24 by %c3_i32 dim 0 : vector<8x64xf32>, i32 -> vector<8x64xf32>
    %c3_i32_20 = arith.constant 3 : i32
    %56 = vector.broadcast %c3_i32_20 : i32 to vector<8x1xi32>
    %57 = arith.cmpi sge, %26, %56 : vector<8x1xi32>
    %cst_21 = arith.constant 0.000000e+00 : f32
    %58 = vector.shape_cast %57 : vector<8x1xi1> to vector<8x1xi1>
    %59 = vector.broadcast %58 : vector<8x1xi1> to vector<8x64xi1>
    %60 = vector.broadcast %cst_21 : f32 to vector<8x64xf32>
    %61 = arith.select %59, %55, %60 : vector<8x64xi1>, vector<8x64xf32>
    %c0_22 = arith.constant 0 : index
    %c0_23 = arith.constant 0 : index
    %62 = vector.load %arg4[%c0_22, %c0_23] : memref<4x64xf32, #tpu.memory_space<vmem>>, vector<1x64xf32>
    %63 = vector.broadcast %62 : vector<1x64xf32> to vector<8x64xf32>
    %64 = arith.mulf %61, %63 : vector<8x64xf32>
    %65 = arith.addf %54, %64 : vector<8x64xf32>
    %cst_24 = arith.constant 0.000000e+00 : f32
    %66 = vector.broadcast %cst_24 : f32 to vector<8x64xf32>
    %67 = arith.subf %66, %65 : vector<8x64xf32>
    %68 = math.exp %67 : vector<8x64xf32>
    %cst_25 = arith.constant 1.000000e+00 : f32
    %69 = vector.broadcast %cst_25 : f32 to vector<8x64xf32>
    %70 = arith.addf %69, %68 : vector<8x64xf32>
    %71 = tpu.reciprocal %70 {approx = true} : vector<8x64xf32> -> vector<8x64xf32>
    %72 = arith.mulf %65, %71 : vector<8x64xf32>
    %73 = arith.truncf %72 : vector<8x64xf32> to vector<8x64xbf16>
    %c0_26 = arith.constant 0 : index
    %c0_27 = arith.constant 0 : index
    %74 = vector.load %arg6[%c0_26, %c0_27] : memref<64x136xbf16, #tpu.memory_space<vmem>>, vector<64x136xbf16>
    %cst_28 = arith.constant dense<0.000000e+00> : vector<8x136xf32>
    %75 = tpu.matmul %73, %74, %cst_28 {dimension_numbers = #tpu.dot_dimension_numbers<[1], [0], [0], [1], [0, 0, 1, 1], [], []>} : vector<8x64xbf16>, vector<64x136xbf16>, vector<8x136xf32> -> vector<8x136xf32>
    %76 = arith.truncf %24 : vector<8x64xf32> to vector<8x64xbf16>
    %c0_29 = arith.constant 0 : index
    %c0_30 = arith.constant 0 : index
    %77 = vector.load %arg7[%c0_29, %c0_30] : memref<64x72xbf16, #tpu.memory_space<vmem>>, vector<64x72xbf16>
    %cst_31 = arith.constant dense<0.000000e+00> : vector<8x72xf32>
    %78 = tpu.matmul %76, %77, %cst_31 {dimension_numbers = #tpu.dot_dimension_numbers<[1], [0], [0], [1], [0, 0, 1, 1], [], []>} : vector<8x64xbf16>, vector<64x72xbf16>, vector<8x72xf32> -> vector<8x72xf32>
    %79 = vector.extract_strided_slice %75 {offsets = [0, 0], sizes = [8, 64], strides = [1, 1]} : vector<8x136xf32> to vector<8x64xf32>
    %80 = vector.extract_strided_slice %75 {offsets = [0, 64], sizes = [8, 64], strides = [1, 1]} : vector<8x136xf32> to vector<8x64xf32>
    %81 = vector.extract_strided_slice %78 {offsets = [0, 0], sizes = [8, 64], strides = [1, 1]} : vector<8x72xf32> to vector<8x64xf32>
    %82 = vector.extract_strided_slice %75 {offsets = [0, 128], sizes = [8, 8], strides = [1, 1]} : vector<8x136xf32> to vector<8x8xf32>
    %83 = vector.extract_strided_slice %78 {offsets = [0, 64], sizes = [8, 8], strides = [1, 1]} : vector<8x72xf32> to vector<8x8xf32>
    %84 = arith.addf %82, %83 : vector<8x8xf32>
    %c0_32 = arith.constant 0 : index
    %c0_33 = arith.constant 0 : index
    %85 = vector.load %arg8[%c0_32, %c0_33] : memref<1x8xf32, #tpu.memory_space<vmem>>, vector<1x8xf32>
    %86 = vector.broadcast %85 : vector<1x8xf32> to vector<8x8xf32>
    %87 = arith.addf %84, %86 : vector<8x8xf32>
    %88 = vector.extract_strided_slice %87 {offsets = [0, 0], sizes = [8, 4], strides = [1, 1]} : vector<8x8xf32> to vector<8x4xf32>
    %89 = vector.extract_strided_slice %87 {offsets = [0, 4], sizes = [8, 4], strides = [1, 1]} : vector<8x8xf32> to vector<8x4xf32>
    %cst_34 = arith.constant 0.000000e+00 : f32
    %90 = vector.broadcast %cst_34 : f32 to vector<8x4xf32>
    %91 = arith.minimumf %89, %90 : vector<8x4xf32>
    %92 = math.absf %89 : vector<8x4xf32>
    %cst_35 = arith.constant 0.000000e+00 : f32
    %93 = vector.broadcast %cst_35 : f32 to vector<8x4xf32>
    %94 = arith.subf %93, %92 : vector<8x4xf32>
    %95 = math.exp %94 : vector<8x4xf32>
    %cst_36 = arith.constant 1.000000e+00 : f32
    %96 = vector.broadcast %cst_36 : f32 to vector<8x4xf32>
    %97 = arith.addf %96, %95 : vector<8x4xf32>
    %98 = math.log %97 : vector<8x4xf32>
    %99 = arith.subf %91, %98 : vector<8x4xf32>
    %c1_i32_37 = arith.constant 1 : i32
    %100 = vector.broadcast %c1_i32_37 : i32 to vector<8x1xi32>
    %101 = arith.cmpi sge, %26, %100 : vector<8x1xi32>
    %c1_i32_38 = arith.constant 1 : i32
    %102 = tpu.dynamic_rotate %99 by %c1_i32_38 dim 0 : vector<8x4xf32>, i32 -> vector<8x4xf32>
    %cst_39 = arith.constant 0.000000e+00 : f32
    %103 = vector.shape_cast %101 : vector<8x1xi1> to vector<8x1xi1>
    %104 = vector.broadcast %103 : vector<8x1xi1> to vector<8x4xi1>
    %105 = vector.broadcast %cst_39 : f32 to vector<8x4xf32>
    %106 = arith.select %104, %102, %105 : vector<8x4xi1>, vector<8x4xf32>
    %107 = arith.addf %99, %106 : vector<8x4xf32>
    %c2_i32_40 = arith.constant 2 : i32
    %108 = vector.broadcast %c2_i32_40 : i32 to vector<8x1xi32>
    %109 = arith.cmpi sge, %26, %108 : vector<8x1xi32>
    %c2_i32_41 = arith.constant 2 : i32
    %110 = tpu.dynamic_rotate %107 by %c2_i32_41 dim 0 : vector<8x4xf32>, i32 -> vector<8x4xf32>
    %cst_42 = arith.constant 0.000000e+00 : f32
    %111 = vector.shape_cast %109 : vector<8x1xi1> to vector<8x1xi1>
    %112 = vector.broadcast %111 : vector<8x1xi1> to vector<8x4xi1>
    %113 = vector.broadcast %cst_42 : f32 to vector<8x4xf32>
    %114 = arith.select %112, %110, %113 : vector<8x4xi1>, vector<8x4xf32>
    %115 = arith.addf %107, %114 : vector<8x4xf32>
    %c4_i32 = arith.constant 4 : i32
    %116 = vector.broadcast %c4_i32 : i32 to vector<8x1xi32>
    %117 = arith.cmpi sge, %26, %116 : vector<8x1xi32>
    %c4_i32_43 = arith.constant 4 : i32
    %118 = tpu.dynamic_rotate %115 by %c4_i32_43 dim 0 : vector<8x4xf32>, i32 -> vector<8x4xf32>
    %cst_44 = arith.constant 0.000000e+00 : f32
    %119 = vector.shape_cast %117 : vector<8x1xi1> to vector<8x1xi1>
    %120 = vector.broadcast %119 : vector<8x1xi1> to vector<8x4xi1>
    %121 = vector.broadcast %cst_44 : f32 to vector<8x4xf32>
    %122 = arith.select %120, %118, %121 : vector<8x4xi1>, vector<8x4xf32>
    %123 = arith.addf %115, %122 : vector<8x4xf32>
    %124 = tpu.transpose %123, [1, 0] : vector<8x4xf32> -> vector<4x8xf32>
    %125 = tpu.transpose %88, [1, 0] : vector<8x4xf32> -> vector<4x8xf32>
    %126 = tpu.iota {dimensions = array<i32: 0>} : vector<8x8xi32>
    %127 = tpu.iota {dimensions = array<i32: 1>} : vector<8x8xi32>
    %128 = arith.cmpi sge, %126, %127 : vector<8x8xi32>
    %c0_45 = arith.constant 0 : index
    %c0_46 = arith.constant 0 : index
    %129 = vector.load %arg9[%c0_45, %c0_46] : memref<1x64xf32, #tpu.memory_space<vmem>>, vector<1x64xf32>
    %130 = vector.extract_strided_slice %79 {offsets = [0, 0], sizes = [8, 16], strides = [1, 1]} : vector<8x64xf32> to vector<8x16xf32>
    %131 = vector.extract_strided_slice %80 {offsets = [0, 0], sizes = [8, 16], strides = [1, 1]} : vector<8x64xf32> to vector<8x16xf32>
    %cst_47 = arith.constant 2.500000e-01 : f32
    %132 = vector.broadcast %cst_47 : f32 to vector<8x16xf32>
    %133 = arith.mulf %131, %132 : vector<8x16xf32>
    %134 = vector.extract_strided_slice %81 {offsets = [0, 0], sizes = [8, 16], strides = [1, 1]} : vector<8x64xf32> to vector<8x16xf32>
    %135 = vector.extract_strided_slice %123 {offsets = [0, 0], sizes = [8, 1], strides = [1, 1]} : vector<8x4xf32> to vector<8x1xf32>
    %136 = vector.extract_strided_slice %124 {offsets = [0, 0], sizes = [1, 8], strides = [1, 1]} : vector<4x8xf32> to vector<1x8xf32>
    %137 = vector.extract_strided_slice %125 {offsets = [0, 0], sizes = [1, 8], strides = [1, 1]} : vector<4x8xf32> to vector<1x8xf32>
    %138 = vector.broadcast %135 : vector<8x1xf32> to vector<8x8xf32>
    %139 = vector.broadcast %136 : vector<1x8xf32> to vector<8x8xf32>
    %140 = arith.subf %138, %139 : vector<8x8xf32>
    %cst_48 = arith.constant -1.000000e+30 : f32
    %141 = vector.broadcast %cst_48 : f32 to vector<8x8xf32>
    %142 = arith.select %128, %140, %141 : vector<8x8xi1>, vector<8x8xf32>
    %143 = vector.broadcast %137 : vector<1x8xf32> to vector<8x8xf32>
    %144 = arith.addf %142, %143 : vector<8x8xf32>
    %cst_49 = arith.constant dense<0xFF800000> : vector<8xf32>
    %145 = vector.multi_reduction <maximumf>, %144, %cst_49 [1] : vector<8x8xf32> to vector<8xf32>
    %146 = vector.shape_cast %145 : vector<8xf32> to vector<8x1xf32>
    %cst_50 = arith.constant -8.000000e+01 : f32
    %147 = vector.broadcast %cst_50 : f32 to vector<8x1xf32>
    %148 = arith.maximumf %146, %147 : vector<8x1xf32>
    %149 = vector.broadcast %148 : vector<8x1xf32> to vector<8x8xf32>
    %150 = arith.subf %144, %149 : vector<8x8xf32>
    %151 = math.exp %150 : vector<8x8xf32>
    %152 = arith.truncf %130 : vector<8x16xf32> to vector<8x16xbf16>
    %153 = arith.truncf %133 : vector<8x16xf32> to vector<8x16xbf16>
    %cst_51 = arith.constant dense<0.000000e+00> : vector<8x8xf32>
    %154 = tpu.matmul %152, %153, %cst_51 {dimension_numbers = #tpu.dot_dimension_numbers<[1], [1], [0], [0], [0, 0, 1, 0], [], []>} : vector<8x16xbf16>, vector<8x16xbf16>, vector<8x8xf32> -> vector<8x8xf32>
    %155 = arith.mulf %154, %151 : vector<8x8xf32>
    %cst_52 = arith.constant dense<0.000000e+00> : vector<8xf32>
    %156 = vector.multi_reduction <add>, %155, %cst_52 [1] : vector<8x8xf32> to vector<8xf32>
    %157 = vector.shape_cast %156 : vector<8xf32> to vector<8x1xf32>
    %158 = math.absf %157 : vector<8x1xf32>
    %cst_53 = arith.constant 0.000000e+00 : f32
    %159 = vector.broadcast %cst_53 : f32 to vector<8x1xf32>
    %160 = arith.subf %159, %148 : vector<8x1xf32>
    %161 = math.exp %160 : vector<8x1xf32>
    %162 = arith.maximumf %158, %161 : vector<8x1xf32>
    %cst_54 = arith.constant 9.99999997E-7 : f32
    %163 = vector.broadcast %cst_54 : f32 to vector<8x1xf32>
    %164 = arith.addf %162, %163 : vector<8x1xf32>
    %165 = tpu.reciprocal %164 {approx = true} : vector<8x1xf32> -> vector<8x1xf32>
    %166 = vector.broadcast %165 : vector<8x1xf32> to vector<8x8xf32>
    %167 = arith.mulf %155, %166 : vector<8x8xf32>
    %168 = arith.truncf %167 : vector<8x8xf32> to vector<8x8xbf16>
    %169 = arith.truncf %134 : vector<8x16xf32> to vector<8x16xbf16>
    %cst_55 = arith.constant dense<0.000000e+00> : vector<8x16xf32>
    %170 = tpu.matmul %168, %169, %cst_55 {dimension_numbers = #tpu.dot_dimension_numbers<[1], [0], [0], [1], [0, 0, 1, 1], [], []>} : vector<8x8xbf16>, vector<8x16xbf16>, vector<8x16xf32> -> vector<8x16xf32>
    %cst_56 = arith.constant dense<0.000000e+00> : vector<8xf32>
    %171 = vector.multi_reduction <add>, %170, %cst_56 [1] : vector<8x16xf32> to vector<8xf32>
    %172 = vector.shape_cast %171 : vector<8xf32> to vector<8x1xf32>
    %cst_57 = arith.constant 1.600000e+01 : f32
    %173 = vector.broadcast %cst_57 : f32 to vector<8x1xf32>
    %174 = arith.divf %172, %173 : vector<8x1xf32>
    %175 = vector.broadcast %174 : vector<8x1xf32> to vector<8x16xf32>
    %176 = arith.subf %170, %175 : vector<8x16xf32>
    %177 = arith.mulf %176, %176 : vector<8x16xf32>
    %cst_58 = arith.constant dense<0.000000e+00> : vector<8xf32>
    %178 = vector.multi_reduction <add>, %177, %cst_58 [1] : vector<8x16xf32> to vector<8xf32>
    %179 = vector.shape_cast %178 : vector<8xf32> to vector<8x1xf32>
    %cst_59 = arith.constant 1.600000e+01 : f32
    %180 = vector.broadcast %cst_59 : f32 to vector<8x1xf32>
    %181 = arith.divf %179, %180 : vector<8x1xf32>
    %cst_60 = arith.constant 9.99999974E-6 : f32
    %182 = vector.broadcast %cst_60 : f32 to vector<8x1xf32>
    %183 = arith.addf %181, %182 : vector<8x1xf32>
    %184 = math.rsqrt %183 : vector<8x1xf32>
    %185 = vector.broadcast %184 : vector<8x1xf32> to vector<8x16xf32>
    %186 = arith.mulf %176, %185 : vector<8x16xf32>
    %187 = vector.extract_strided_slice %129 {offsets = [0, 0], sizes = [1, 16], strides = [1, 1]} : vector<1x64xf32> to vector<1x16xf32>
    %188 = vector.broadcast %187 : vector<1x16xf32> to vector<8x16xf32>
    %189 = arith.mulf %186, %188 : vector<8x16xf32>
    %c0_61 = arith.constant 0 : index
    %c0_62 = arith.constant 0 : index
    %190 = vector.load %arg14[%c0_61, %c0_62] : memref<8x64xf32, #tpu.memory_space<vmem>>, vector<8x16xf32>
    tpu.vector_store %arg14[%c0_61, %c0_62], %189 {strides = array<i32>} : memref<8x64xf32, #tpu.memory_space<vmem>>, vector<8x16xf32>,
    %191 = vector.extract_strided_slice %79 {offsets = [0, 16], sizes = [8, 16], strides = [1, 1]} : vector<8x64xf32> to vector<8x16xf32>
    %192 = vector.extract_strided_slice %80 {offsets = [0, 16], sizes = [8, 16], strides = [1, 1]} : vector<8x64xf32> to vector<8x16xf32>
    %cst_63 = arith.constant 2.500000e-01 : f32
    %193 = vector.broadcast %cst_63 : f32 to vector<8x16xf32>
    %194 = arith.mulf %192, %193 : vector<8x16xf32>
    %195 = vector.extract_strided_slice %81 {offsets = [0, 16], sizes = [8, 16], strides = [1, 1]} : vector<8x64xf32> to vector<8x16xf32>
    %196 = vector.extract_strided_slice %123 {offsets = [0, 1], sizes = [8, 1], strides = [1, 1]} : vector<8x4xf32> to vector<8x1xf32>
    %197 = vector.extract_strided_slice %124 {offsets = [1, 0], sizes = [1, 8], strides = [1, 1]} : vector<4x8xf32> to vector<1x8xf32>
    %198 = vector.extract_strided_slice %125 {offsets = [1, 0], sizes = [1, 8], strides = [1, 1]} : vector<4x8xf32> to vector<1x8xf32>
    %199 = vector.broadcast %196 : vector<8x1xf32> to vector<8x8xf32>
    %200 = vector.broadcast %197 : vector<1x8xf32> to vector<8x8xf32>
    %201 = arith.subf %199, %200 : vector<8x8xf32>
    %cst_64 = arith.constant -1.000000e+30 : f32
    %202 = vector.broadcast %cst_64 : f32 to vector<8x8xf32>
    %203 = arith.select %128, %201, %202 : vector<8x8xi1>, vector<8x8xf32>
    %204 = vector.broadcast %198 : vector<1x8xf32> to vector<8x8xf32>
    %205 = arith.addf %203, %204 : vector<8x8xf32>
    %cst_65 = arith.constant dense<0xFF800000> : vector<8xf32>
    %206 = vector.multi_reduction <maximumf>, %205, %cst_65 [1] : vector<8x8xf32> to vector<8xf32>
    %207 = vector.shape_cast %206 : vector<8xf32> to vector<8x1xf32>
    %cst_66 = arith.constant -8.000000e+01 : f32
    %208 = vector.broadcast %cst_66 : f32 to vector<8x1xf32>
    %209 = arith.maximumf %207, %208 : vector<8x1xf32>
    %210 = vector.broadcast %209 : vector<8x1xf32> to vector<8x8xf32>
    %211 = arith.subf %205, %210 : vector<8x8xf32>
    %212 = math.exp %211 : vector<8x8xf32>
    %213 = arith.truncf %191 : vector<8x16xf32> to vector<8x16xbf16>
    %214 = arith.truncf %194 : vector<8x16xf32> to vector<8x16xbf16>
    %cst_67 = arith.constant dense<0.000000e+00> : vector<8x8xf32>
    %215 = tpu.matmul %213, %214, %cst_67 {dimension_numbers = #tpu.dot_dimension_numbers<[1], [1], [0], [0], [0, 0, 1, 0], [], []>} : vector<8x16xbf16>, vector<8x16xbf16>, vector<8x8xf32> -> vector<8x8xf32>
    %216 = arith.mulf %215, %212 : vector<8x8xf32>
    %cst_68 = arith.constant dense<0.000000e+00> : vector<8xf32>
    %217 = vector.multi_reduction <add>, %216, %cst_68 [1] : vector<8x8xf32> to vector<8xf32>
    %218 = vector.shape_cast %217 : vector<8xf32> to vector<8x1xf32>
    %219 = math.absf %218 : vector<8x1xf32>
    %cst_69 = arith.constant 0.000000e+00 : f32
    %220 = vector.broadcast %cst_69 : f32 to vector<8x1xf32>
    %221 = arith.subf %220, %209 : vector<8x1xf32>
    %222 = math.exp %221 : vector<8x1xf32>
    %223 = arith.maximumf %219, %222 : vector<8x1xf32>
    %cst_70 = arith.constant 9.99999997E-7 : f32
    %224 = vector.broadcast %cst_70 : f32 to vector<8x1xf32>
    %225 = arith.addf %223, %224 : vector<8x1xf32>
    %226 = tpu.reciprocal %225 {approx = true} : vector<8x1xf32> -> vector<8x1xf32>
    %227 = vector.broadcast %226 : vector<8x1xf32> to vector<8x8xf32>
    %228 = arith.mulf %216, %227 : vector<8x8xf32>
    %229 = arith.truncf %228 : vector<8x8xf32> to vector<8x8xbf16>
    %230 = arith.truncf %195 : vector<8x16xf32> to vector<8x16xbf16>
    %cst_71 = arith.constant dense<0.000000e+00> : vector<8x16xf32>
    %231 = tpu.matmul %229, %230, %cst_71 {dimension_numbers = #tpu.dot_dimension_numbers<[1], [0], [0], [1], [0, 0, 1, 1], [], []>} : vector<8x8xbf16>, vector<8x16xbf16>, vector<8x16xf32> -> vector<8x16xf32>
    %cst_72 = arith.constant dense<0.000000e+00> : vector<8xf32>
    %232 = vector.multi_reduction <add>, %231, %cst_72 [1] : vector<8x16xf32> to vector<8xf32>
    %233 = vector.shape_cast %232 : vector<8xf32> to vector<8x1xf32>
    %cst_73 = arith.constant 1.600000e+01 : f32
    %234 = vector.broadcast %cst_73 : f32 to vector<8x1xf32>
    %235 = arith.divf %233, %234 : vector<8x1xf32>
    %236 = vector.broadcast %235 : vector<8x1xf32> to vector<8x16xf32>
    %237 = arith.subf %231, %236 : vector<8x16xf32>
    %238 = arith.mulf %237, %237 : vector<8x16xf32>
    %cst_74 = arith.constant dense<0.000000e+00> : vector<8xf32>
    %239 = vector.multi_reduction <add>, %238, %cst_74 [1] : vector<8x16xf32> to vector<8xf32>
    %240 = vector.shape_cast %239 : vector<8xf32> to vector<8x1xf32>
    %cst_75 = arith.constant 1.600000e+01 : f32
    %241 = vector.broadcast %cst_75 : f32 to vector<8x1xf32>
    %242 = arith.divf %240, %241 : vector<8x1xf32>
    %cst_76 = arith.constant 9.99999974E-6 : f32
    %243 = vector.broadcast %cst_76 : f32 to vector<8x1xf32>
    %244 = arith.addf %242, %243 : vector<8x1xf32>
    %245 = math.rsqrt %244 : vector<8x1xf32>
    %246 = vector.broadcast %245 : vector<8x1xf32> to vector<8x16xf32>
    %247 = arith.mulf %237, %246 : vector<8x16xf32>
    %248 = vector.extract_strided_slice %129 {offsets = [0, 16], sizes = [1, 16], strides = [1, 1]} : vector<1x64xf32> to vector<1x16xf32>
    %249 = vector.broadcast %248 : vector<1x16xf32> to vector<8x16xf32>
    %250 = arith.mulf %247, %249 : vector<8x16xf32>
    %c0_77 = arith.constant 0 : index
    %c16 = arith.constant 16 : index
    %251 = vector.load %arg14[%c0_77, %c16] : memref<8x64xf32, #tpu.memory_space<vmem>>, vector<8x16xf32>
    tpu.vector_store %arg14[%c0_77, %c16], %250 {strides = array<i32>} : memref<8x64xf32, #tpu.memory_space<vmem>>, vector<8x16xf32>,
    %252 = vector.extract_strided_slice %79 {offsets = [0, 32], sizes = [8, 16], strides = [1, 1]} : vector<8x64xf32> to vector<8x16xf32>
    %253 = vector.extract_strided_slice %80 {offsets = [0, 32], sizes = [8, 16], strides = [1, 1]} : vector<8x64xf32> to vector<8x16xf32>
    %cst_78 = arith.constant 2.500000e-01 : f32
    %254 = vector.broadcast %cst_78 : f32 to vector<8x16xf32>
    %255 = arith.mulf %253, %254 : vector<8x16xf32>
    %256 = vector.extract_strided_slice %81 {offsets = [0, 32], sizes = [8, 16], strides = [1, 1]} : vector<8x64xf32> to vector<8x16xf32>
    %257 = vector.extract_strided_slice %123 {offsets = [0, 2], sizes = [8, 1], strides = [1, 1]} : vector<8x4xf32> to vector<8x1xf32>
    %258 = vector.extract_strided_slice %124 {offsets = [2, 0], sizes = [1, 8], strides = [1, 1]} : vector<4x8xf32> to vector<1x8xf32>
    %259 = vector.extract_strided_slice %125 {offsets = [2, 0], sizes = [1, 8], strides = [1, 1]} : vector<4x8xf32> to vector<1x8xf32>
    %260 = vector.broadcast %257 : vector<8x1xf32> to vector<8x8xf32>
    %261 = vector.broadcast %258 : vector<1x8xf32> to vector<8x8xf32>
    %262 = arith.subf %260, %261 : vector<8x8xf32>
    %cst_79 = arith.constant -1.000000e+30 : f32
    %263 = vector.broadcast %cst_79 : f32 to vector<8x8xf32>
    %264 = arith.select %128, %262, %263 : vector<8x8xi1>, vector<8x8xf32>
    %265 = vector.broadcast %259 : vector<1x8xf32> to vector<8x8xf32>
    %266 = arith.addf %264, %265 : vector<8x8xf32>
    %cst_80 = arith.constant dense<0xFF800000> : vector<8xf32>
    %267 = vector.multi_reduction <maximumf>, %266, %cst_80 [1] : vector<8x8xf32> to vector<8xf32>
    %268 = vector.shape_cast %267 : vector<8xf32> to vector<8x1xf32>
    %cst_81 = arith.constant -8.000000e+01 : f32
    %269 = vector.broadcast %cst_81 : f32 to vector<8x1xf32>
    %270 = arith.maximumf %268, %269 : vector<8x1xf32>
    %271 = vector.broadcast %270 : vector<8x1xf32> to vector<8x8xf32>
    %272 = arith.subf %266, %271 : vector<8x8xf32>
    %273 = math.exp %272 : vector<8x8xf32>
    %274 = arith.truncf %252 : vector<8x16xf32> to vector<8x16xbf16>
    %275 = arith.truncf %255 : vector<8x16xf32> to vector<8x16xbf16>
    %cst_82 = arith.constant dense<0.000000e+00> : vector<8x8xf32>
    %276 = tpu.matmul %274, %275, %cst_82 {dimension_numbers = #tpu.dot_dimension_numbers<[1], [1], [0], [0], [0, 0, 1, 0], [], []>} : vector<8x16xbf16>, vector<8x16xbf16>, vector<8x8xf32> -> vector<8x8xf32>
    %277 = arith.mulf %276, %273 : vector<8x8xf32>
    %cst_83 = arith.constant dense<0.000000e+00> : vector<8xf32>
    %278 = vector.multi_reduction <add>, %277, %cst_83 [1] : vector<8x8xf32> to vector<8xf32>
    %279 = vector.shape_cast %278 : vector<8xf32> to vector<8x1xf32>
    %280 = math.absf %279 : vector<8x1xf32>
    %cst_84 = arith.constant 0.000000e+00 : f32
    %281 = vector.broadcast %cst_84 : f32 to vector<8x1xf32>
    %282 = arith.subf %281, %270 : vector<8x1xf32>
    %283 = math.exp %282 : vector<8x1xf32>
    %284 = arith.maximumf %280, %283 : vector<8x1xf32>
    %cst_85 = arith.constant 9.99999997E-7 : f32
    %285 = vector.broadcast %cst_85 : f32 to vector<8x1xf32>
    %286 = arith.addf %284, %285 : vector<8x1xf32>
    %287 = tpu.reciprocal %286 {approx = true} : vector<8x1xf32> -> vector<8x1xf32>
    %288 = vector.broadcast %287 : vector<8x1xf32> to vector<8x8xf32>
    %289 = arith.mulf %277, %288 : vector<8x8xf32>
    %290 = arith.truncf %289 : vector<8x8xf32> to vector<8x8xbf16>
    %291 = arith.truncf %256 : vector<8x16xf32> to vector<8x16xbf16>
    %cst_86 = arith.constant dense<0.000000e+00> : vector<8x16xf32>
    %292 = tpu.matmul %290, %291, %cst_86 {dimension_numbers = #tpu.dot_dimension_numbers<[1], [0], [0], [1], [0, 0, 1, 1], [], []>} : vector<8x8xbf16>, vector<8x16xbf16>, vector<8x16xf32> -> vector<8x16xf32>
    %cst_87 = arith.constant dense<0.000000e+00> : vector<8xf32>
    %293 = vector.multi_reduction <add>, %292, %cst_87 [1] : vector<8x16xf32> to vector<8xf32>
    %294 = vector.shape_cast %293 : vector<8xf32> to vector<8x1xf32>
    %cst_88 = arith.constant 1.600000e+01 : f32
    %295 = vector.broadcast %cst_88 : f32 to vector<8x1xf32>
    %296 = arith.divf %294, %295 : vector<8x1xf32>
    %297 = vector.broadcast %296 : vector<8x1xf32> to vector<8x16xf32>
    %298 = arith.subf %292, %297 : vector<8x16xf32>
    %299 = arith.mulf %298, %298 : vector<8x16xf32>
    %cst_89 = arith.constant dense<0.000000e+00> : vector<8xf32>
    %300 = vector.multi_reduction <add>, %299, %cst_89 [1] : vector<8x16xf32> to vector<8xf32>
    %301 = vector.shape_cast %300 : vector<8xf32> to vector<8x1xf32>
    %cst_90 = arith.constant 1.600000e+01 : f32
    %302 = vector.broadcast %cst_90 : f32 to vector<8x1xf32>
    %303 = arith.divf %301, %302 : vector<8x1xf32>
    %cst_91 = arith.constant 9.99999974E-6 : f32
    %304 = vector.broadcast %cst_91 : f32 to vector<8x1xf32>
    %305 = arith.addf %303, %304 : vector<8x1xf32>
    %306 = math.rsqrt %305 : vector<8x1xf32>
    %307 = vector.broadcast %306 : vector<8x1xf32> to vector<8x16xf32>
    %308 = arith.mulf %298, %307 : vector<8x16xf32>
    %309 = vector.extract_strided_slice %129 {offsets = [0, 32], sizes = [1, 16], strides = [1, 1]} : vector<1x64xf32> to vector<1x16xf32>
    %310 = vector.broadcast %309 : vector<1x16xf32> to vector<8x16xf32>
    %311 = arith.mulf %308, %310 : vector<8x16xf32>
    %c0_92 = arith.constant 0 : index
    %c32 = arith.constant 32 : index
    %312 = vector.load %arg14[%c0_92, %c32] : memref<8x64xf32, #tpu.memory_space<vmem>>, vector<8x16xf32>
    tpu.vector_store %arg14[%c0_92, %c32], %311 {strides = array<i32>} : memref<8x64xf32, #tpu.memory_space<vmem>>, vector<8x16xf32>,
    %313 = vector.extract_strided_slice %79 {offsets = [0, 48], sizes = [8, 16], strides = [1, 1]} : vector<8x64xf32> to vector<8x16xf32>
    %314 = vector.extract_strided_slice %80 {offsets = [0, 48], sizes = [8, 16], strides = [1, 1]} : vector<8x64xf32> to vector<8x16xf32>
    %cst_93 = arith.constant 2.500000e-01 : f32
    %315 = vector.broadcast %cst_93 : f32 to vector<8x16xf32>
    %316 = arith.mulf %314, %315 : vector<8x16xf32>
    %317 = vector.extract_strided_slice %81 {offsets = [0, 48], sizes = [8, 16], strides = [1, 1]} : vector<8x64xf32> to vector<8x16xf32>
    %318 = vector.extract_strided_slice %123 {offsets = [0, 3], sizes = [8, 1], strides = [1, 1]} : vector<8x4xf32> to vector<8x1xf32>
    %319 = vector.extract_strided_slice %124 {offsets = [3, 0], sizes = [1, 8], strides = [1, 1]} : vector<4x8xf32> to vector<1x8xf32>
    %320 = vector.extract_strided_slice %125 {offsets = [3, 0], sizes = [1, 8], strides = [1, 1]} : vector<4x8xf32> to vector<1x8xf32>
    %321 = vector.broadcast %318 : vector<8x1xf32> to vector<8x8xf32>
    %322 = vector.broadcast %319 : vector<1x8xf32> to vector<8x8xf32>
    %323 = arith.subf %321, %322 : vector<8x8xf32>
    %cst_94 = arith.constant -1.000000e+30 : f32
    %324 = vector.broadcast %cst_94 : f32 to vector<8x8xf32>
    %325 = arith.select %128, %323, %324 : vector<8x8xi1>, vector<8x8xf32>
    %326 = vector.broadcast %320 : vector<1x8xf32> to vector<8x8xf32>
    %327 = arith.addf %325, %326 : vector<8x8xf32>
    %cst_95 = arith.constant dense<0xFF800000> : vector<8xf32>
    %328 = vector.multi_reduction <maximumf>, %327, %cst_95 [1] : vector<8x8xf32> to vector<8xf32>
    %329 = vector.shape_cast %328 : vector<8xf32> to vector<8x1xf32>
    %cst_96 = arith.constant -8.000000e+01 : f32
    %330 = vector.broadcast %cst_96 : f32 to vector<8x1xf32>
    %331 = arith.maximumf %329, %330 : vector<8x1xf32>
    %332 = vector.broadcast %331 : vector<8x1xf32> to vector<8x8xf32>
    %333 = arith.subf %327, %332 : vector<8x8xf32>
    %334 = math.exp %333 : vector<8x8xf32>
    %335 = arith.truncf %313 : vector<8x16xf32> to vector<8x16xbf16>
    %336 = arith.truncf %316 : vector<8x16xf32> to vector<8x16xbf16>
    %cst_97 = arith.constant dense<0.000000e+00> : vector<8x8xf32>
    %337 = tpu.matmul %335, %336, %cst_97 {dimension_numbers = #tpu.dot_dimension_numbers<[1], [1], [0], [0], [0, 0, 1, 0], [], []>} : vector<8x16xbf16>, vector<8x16xbf16>, vector<8x8xf32> -> vector<8x8xf32>
    %338 = arith.mulf %337, %334 : vector<8x8xf32>
    %cst_98 = arith.constant dense<0.000000e+00> : vector<8xf32>
    %339 = vector.multi_reduction <add>, %338, %cst_98 [1] : vector<8x8xf32> to vector<8xf32>
    %340 = vector.shape_cast %339 : vector<8xf32> to vector<8x1xf32>
    %341 = math.absf %340 : vector<8x1xf32>
    %cst_99 = arith.constant 0.000000e+00 : f32
    %342 = vector.broadcast %cst_99 : f32 to vector<8x1xf32>
    %343 = arith.subf %342, %331 : vector<8x1xf32>
    %344 = math.exp %343 : vector<8x1xf32>
    %345 = arith.maximumf %341, %344 : vector<8x1xf32>
    %cst_100 = arith.constant 9.99999997E-7 : f32
    %346 = vector.broadcast %cst_100 : f32 to vector<8x1xf32>
    %347 = arith.addf %345, %346 : vector<8x1xf32>
    %348 = tpu.reciprocal %347 {approx = true} : vector<8x1xf32> -> vector<8x1xf32>
    %349 = vector.broadcast %348 : vector<8x1xf32> to vector<8x8xf32>
    %350 = arith.mulf %338, %349 : vector<8x8xf32>
    %351 = arith.truncf %350 : vector<8x8xf32> to vector<8x8xbf16>
    %352 = arith.truncf %317 : vector<8x16xf32> to vector<8x16xbf16>
    %cst_101 = arith.constant dense<0.000000e+00> : vector<8x16xf32>
    %353 = tpu.matmul %351, %352, %cst_101 {dimension_numbers = #tpu.dot_dimension_numbers<[1], [0], [0], [1], [0, 0, 1, 1], [], []>} : vector<8x8xbf16>, vector<8x16xbf16>, vector<8x16xf32> -> vector<8x16xf32>
    %cst_102 = arith.constant dense<0.000000e+00> : vector<8xf32>
    %354 = vector.multi_reduction <add>, %353, %cst_102 [1] : vector<8x16xf32> to vector<8xf32>
    %355 = vector.shape_cast %354 : vector<8xf32> to vector<8x1xf32>
    %cst_103 = arith.constant 1.600000e+01 : f32
    %356 = vector.broadcast %cst_103 : f32 to vector<8x1xf32>
    %357 = arith.divf %355, %356 : vector<8x1xf32>
    %358 = vector.broadcast %357 : vector<8x1xf32> to vector<8x16xf32>
    %359 = arith.subf %353, %358 : vector<8x16xf32>
    %360 = arith.mulf %359, %359 : vector<8x16xf32>
    %cst_104 = arith.constant dense<0.000000e+00> : vector<8xf32>
    %361 = vector.multi_reduction <add>, %360, %cst_104 [1] : vector<8x16xf32> to vector<8xf32>
    %362 = vector.shape_cast %361 : vector<8xf32> to vector<8x1xf32>
    %cst_105 = arith.constant 1.600000e+01 : f32
    %363 = vector.broadcast %cst_105 : f32 to vector<8x1xf32>
    %364 = arith.divf %362, %363 : vector<8x1xf32>
    %cst_106 = arith.constant 9.99999974E-6 : f32
    %365 = vector.broadcast %cst_106 : f32 to vector<8x1xf32>
    %366 = arith.addf %364, %365 : vector<8x1xf32>
    %367 = math.rsqrt %366 : vector<8x1xf32>
    %368 = vector.broadcast %367 : vector<8x1xf32> to vector<8x16xf32>
    %369 = arith.mulf %359, %368 : vector<8x16xf32>
    %370 = vector.extract_strided_slice %129 {offsets = [0, 48], sizes = [1, 16], strides = [1, 1]} : vector<1x64xf32> to vector<1x16xf32>
    %371 = vector.broadcast %370 : vector<1x16xf32> to vector<8x16xf32>
    %372 = arith.mulf %369, %371 : vector<8x16xf32>
    %c0_107 = arith.constant 0 : index
    %c48 = arith.constant 48 : index
    %373 = vector.load %arg14[%c0_107, %c48] : memref<8x64xf32, #tpu.memory_space<vmem>>, vector<8x16xf32>
    tpu.vector_store %arg14[%c0_107, %c48], %372 {strides = array<i32>} : memref<8x64xf32, #tpu.memory_space<vmem>>, vector<8x16xf32>,
    %c0_108 = arith.constant 0 : index
    %c0_109 = arith.constant 0 : index
    %374 = vector.load %arg14[%c0_108, %c0_109] : memref<8x64xf32, #tpu.memory_space<vmem>>, vector<8x64xf32>
    %c0_110 = arith.constant 0 : index
    %c0_111 = arith.constant 0 : index
    %375 = vector.load %arg10[%c0_110, %c0_111] : memref<1x64xf32, #tpu.memory_space<vmem>>, vector<1x64xf32>
    %376 = vector.broadcast %375 : vector<1x64xf32> to vector<8x64xf32>
    %377 = arith.mulf %376, %72 : vector<8x64xf32>
    %378 = arith.addf %374, %377 : vector<8x64xf32>
    %cst_112 = arith.constant 0.000000e+00 : f32
    %379 = vector.broadcast %cst_112 : f32 to vector<8x64xf32>
    %380 = arith.subf %379, %25 : vector<8x64xf32>
    %381 = math.exp %380 : vector<8x64xf32>
    %cst_113 = arith.constant 1.000000e+00 : f32
    %382 = vector.broadcast %cst_113 : f32 to vector<8x64xf32>
    %383 = arith.addf %382, %381 : vector<8x64xf32>
    %384 = tpu.reciprocal %383 {approx = true} : vector<8x64xf32> -> vector<8x64xf32>
    %385 = arith.mulf %25, %384 : vector<8x64xf32>
    %386 = arith.mulf %378, %385 : vector<8x64xf32>
    %387 = arith.truncf %386 : vector<8x64xf32> to vector<8x64xbf16>
    %c0_114 = arith.constant 0 : index
    %c0_115 = arith.constant 0 : index
    %388 = vector.load %arg11[%c0_114, %c0_115] : memref<64x32xbf16, #tpu.memory_space<vmem>>, vector<64x32xbf16>
    %cst_116 = arith.constant dense<0.000000e+00> : vector<8x32xf32>
    %389 = tpu.matmul %387, %388, %cst_116 {dimension_numbers = #tpu.dot_dimension_numbers<[1], [0], [0], [1], [0, 0, 1, 1], [], []>} : vector<8x64xbf16>, vector<64x32xbf16>, vector<8x32xf32> -> vector<8x32xf32>
    %390 = arith.addf %1, %389 : vector<8x32xf32>
    %c0_117 = arith.constant 0 : index
    %c0_118 = arith.constant 0 : index
    %c0_119 = arith.constant 0 : index
    %391 = vector.load %arg13[%c0_117, %c0_118, %c0_119] : memref<1x8x32xf32, #tpu.memory_space<vmem>>, vector<1x8x32xf32>
    %392 = vector.shape_cast %391 : vector<1x8x32xf32> to vector<8x32xf32>
    %393 = vector.shape_cast %390 : vector<8x32xf32> to vector<1x8x32xf32>
    tpu.vector_store %arg13[%c0_117, %c0_118, %c0_119], %393 {strides = array<i32>} : memref<1x8x32xf32, #tpu.memory_space<vmem>>, vector<1x8x32xf32>,
    return
  }
  func.func @transform_0(%arg0: i32) -> (i32, i32, i32) {
    %c0_i32 = arith.constant 0 : i32
    %c0_i32_0 = arith.constant 0 : i32
    %c0_i32_1 = arith.constant 0 : i32
    return %arg0, %c0_i32, %c0_i32_0 : i32, i32, i32
  }
  func.func @transform_1(%arg0: i32) -> (i32, i32) {
    %c0_i32 = arith.constant 0 : i32
    %c0_i32_0 = arith.constant 0 : i32
    %c0_i32_1 = arith.constant 0 : i32
    return %c0_i32, %c0_i32_0 : i32, i32
  }
  func.func @transform_2(%arg0: i32) -> (i32, i32) {
    %c0_i32 = arith.constant 0 : i32
    %c0_i32_0 = arith.constant 0 : i32
    %c0_i32_1 = arith.constant 0 : i32
    return %c0_i32, %c0_i32_0 : i32, i32
  }
  func.func @transform_3(%arg0: i32) -> (i32, i32) {
    %c0_i32 = arith.constant 0 : i32
    %c0_i32_0 = arith.constant 0 : i32
    %c0_i32_1 = arith.constant 0 : i32
    return %c0_i32, %c0_i32_0 : i32, i32
  }
  func.func @transform_4(%arg0: i32) -> (i32, i32) {
    %c0_i32 = arith.constant 0 : i32
    %c0_i32_0 = arith.constant 0 : i32
    %c0_i32_1 = arith.constant 0 : i32
    return %c0_i32, %c0_i32_0 : i32, i32
  }
  func.func @transform_5(%arg0: i32) -> (i32, i32) {
    %c0_i32 = arith.constant 0 : i32
    %c0_i32_0 = arith.constant 0 : i32
    %c0_i32_1 = arith.constant 0 : i32
    return %c0_i32, %c0_i32_0 : i32, i32
  }
  func.func @transform_6(%arg0: i32) -> (i32, i32) {
    %c0_i32 = arith.constant 0 : i32
    %c0_i32_0 = arith.constant 0 : i32
    %c0_i32_1 = arith.constant 0 : i32
    return %c0_i32, %c0_i32_0 : i32, i32
  }
  func.func @transform_7(%arg0: i32) -> (i32, i32) {
    %c0_i32 = arith.constant 0 : i32
    %c0_i32_0 = arith.constant 0 : i32
    %c0_i32_1 = arith.constant 0 : i32
    return %c0_i32, %c0_i32_0 : i32, i32
  }
  func.func @transform_8(%arg0: i32) -> (i32, i32) {
    %c0_i32 = arith.constant 0 : i32
    %c0_i32_0 = arith.constant 0 : i32
    %c0_i32_1 = arith.constant 0 : i32
    return %c0_i32, %c0_i32_0 : i32, i32
  }
  func.func @transform_9(%arg0: i32) -> (i32, i32) {
    %c0_i32 = arith.constant 0 : i32
    %c0_i32_0 = arith.constant 0 : i32
    %c0_i32_1 = arith.constant 0 : i32
    return %c0_i32, %c0_i32_0 : i32, i32
  }
  func.func @transform_10(%arg0: i32) -> (i32, i32) {
    %c0_i32 = arith.constant 0 : i32
    %c0_i32_0 = arith.constant 0 : i32
    %c0_i32_1 = arith.constant 0 : i32
    return %c0_i32, %c0_i32_0 : i32, i32
  }
  func.func @transform_11(%arg0: i32) -> (i32, i32) {
    %c0_i32 = arith.constant 0 : i32
    %c0_i32_0 = arith.constant 0 : i32
    %c0_i32_1 = arith.constant 0 : i32
    return %c0_i32, %c0_i32_0 : i32, i32
  }
  func.func @transform_12(%arg0: i32) -> (i32, i32, i32) {
    %c0_i32 = arith.constant 0 : i32
    %c0_i32_0 = arith.constant 0 : i32
    %c0_i32_1 = arith.constant 0 : i32
    return %arg0, %c0_i32, %c0_i32_0 : i32, i32, i32
  }
}

</mosaic_0001>

<bundles_post_ra>
// kernel: tpu_custom_call.1
= control target key start
LH: loop header
LB: loop body
LE: loop exit
PB: predicated region body
PF: predicated region fallthrough
CT: control target
= control target key end

     0   :  { %s3525_s0 = inlined_call_operand.hbm [shape: f32[2,8,32], index: 0, kind: input, shape index: {}]   ;;  %s3526_s1 = inlined_call_operand.hbm [shape: f32[1,32], index: 1, kind: input, shape index: {}]   ;;  %s3527_s2 = inlined_call_operand.hbm [shape: bf16[32,128], index: 2, kind: input, shape index: {}]   ;;  %s3528_s3 = inlined_call_operand.hbm [shape: f32[4,64], index: 3, kind: input, shape index: {}]   ;;  %s3529_s4 = inlined_call_operand.hbm [shape: f32[1,64], index: 4, kind: input, shape index: {}]   ;;  %s3530_s5 = inlined_call_operand.hbm [shape: bf16[64,136], index: 5, kind: input, shape index: {}]   ;;  %s3531_s6 = inlined_call_operand.hbm [shape: bf16[64,72], index: 6, kind: input, shape index: {}]   ;;  %s3532_s7 = inlined_call_operand.hbm [shape: f32[1,8], index: 7, kind: input, shape index: {}]   ;;  %s3533_s8 = inlined_call_operand.hbm [shape: f32[1,64], index: 8, kind: input, shape index: {}]   ;;  %s3534_s9 = inlined_call_operand.hbm [shape: f32[1,64], index: 9, kind: input, shape index: {}]   ;;  %s3535_s10 = inlined_call_operand.hbm [shape: bf16[64,32], index: 10, kind: input, shape index: {}]   ;;  %s3536_s11 = inlined_call_operand.hbm [shape: f32[1,32], index: 11, kind: input, shape index: {}]   ;;  %s3537_s12 = inlined_call_operand.hbm [shape: f32[2,8,32], index: 12, kind: output, shape index: {}]  }
   0x1   :  { %3547 = sst [smem:[#allocation34_spill]] %s3525_s0 }
   0x2   :  { %3548 = sst [smem:[#allocation35_spill]] %s3526_s1 }
   0x3   :  { %3549 = sst [smem:[#allocation36_spill]] %s3528_s3 }
   0x4   :  { %3550 = sst [smem:[#allocation37_spill]] %s3537_s12 }
   0x5   :  { %17 = vsyncpa [#allocation4], 0 }
   0x6   :  { %19 = vsyncpa [#allocation4 + $0x1], 0 }
   0x7   :  { %20 = vsyncpa [#allocation7], 0 }
   0x8   :  { %21 = vsyncpa [#allocation10], 0 }
   0x9   :  { %22 = vsyncpa [#allocation13], 0 }
   0xa   :  { %23 = vsyncpa [#allocation16], 0 }
   0xb   :  { %24 = vsyncpa [#allocation19], 0 }
   0xc   :  { %25 = vsyncpa [#allocation22], 0 }
   0xd   :  { %26 = vsyncpa [#allocation5], 0 }
   0xe   :  { %28 = vsyncpa [#allocation5 + $0x1], 0  ;;  %s2895_s21 = smov 0   ;;  %s2897_s22 = smov 0  }
   0xf   :  { %s2899_s23 = smov 0   ;;  %s2901_s24 = smov 0  }
  0x10 LB: > { %s2797_s25 = smov [#allocation6]   ;;  %s2916_s27 = sadd.s32 4294967295, %s2795_s24   ;;  %s2795_s24 = sphi %s2901_s24, %s3587_s24   ;;  %s2791_s23 = sphi %s2899_s23, %s3586_s23   ;;  %s2787_s22 = sphi %s2897_s22, %s3585_s22   ;;  %s2783_s21 = sphi %s2895_s21, %s3584_s21  }
  0x11   : > { %s335_s26 = sshll.u32 %s2797_s25, 4  ;;  %3551 = sst [smem:[#allocation32_spill]] %s2916_s27  ;;  %s2921_s26 = int_to_ptr.vmem [resolvable:$true] %s335_s26 }
  0x12   : > { %p1936_p0 = scmp.ge.s32.totalorder %s2795_s24, 1  ;;  %p3544_p1 = scmp.eq.s32.totalorder %s2916_s27, 0 }
  0x13   : > { %p322_p2 = scmp.lt.s32.totalorder %s2795_s24, 3  ;;  %s2798_s29 = smov [#allocation9]  }
  0x14   : > { %s359_s30 = sshll.u32 %s2798_s29, 4  ;;  %s2799_s13 = smov [#allocation12]   ;;  %s2930_s30 = int_to_ptr.vmem [resolvable:$true] %s359_s30 }
  0x15   : > { %p2923_p3 = pnand %p1936_p0, %p322_p2  ;;  %s380_s14 = sshll.u32 %s2799_s13, 4  ;;  %s2938_s14 = int_to_ptr.vmem [resolvable:$true] %s380_s14 }
  0x16   : > { %s3555_s1 = sld [smem:[#allocation35_spill]] }
  0x17   : > { %s3552_s28 = scalar_select %p2923_p3, 1, 0 }
  0x18   : > { %p2165_p5 = pneg %p2923_p3 }
  0x19   : > { %3553 = sst [smem:[#allocation33_spill]] %s3552_s28 }
  0x1a   : > { %p2934_p6 = pnand %p2165_p5, %p3544_p1 }
  0x1c   : > { %s2367_s18 = scalar_lea.hbm %s3555_s1, 16  ;;  %p2948_p8 = pneg %p2934_p6 }
  0x1d   : > { %p2368_p7 = scmp.ne.s32.totalorder %s3555_s1, %s2367_s18  ;;  %p2374_p11 = scmp.lt.u32.totalorder %s2367_s18, %s3555_s1 }
  0x1f   : > { %p2370_p9 = pnand %p2948_p8, %p2368_p7 }
  0x21   : > { %p2371_p10 = pneg %p2370_p9 }
  0x23   : > { %p2376_p12 = pnand %p2374_p11, %p2371_p10 }
  0x25   : > { %2379 = shalt.err (!%p2376_p12)
}
  0x26   : > { %s2380_s16 = scalar_lea.vmem %s2921_s26, 16  ;;  %s2387_s17 = scalar_lea.vmem %s2921_s26, 32 }
  0x27   : > { %p2381_p13 = scmp.ne.s32.totalorder %s2921_s26, %s2380_s16  ;;  %p2388_p5 = scmp.lt.s32.totalorder %s2921_s26, %s2921_s26 }
  0x28   : > { %p2389_p7 = scmp.lt.s32.totalorder %s2387_s17, %s2380_s16 }
  0x29   : > { %p2383_p0 = pnand %p2381_p13, %p2948_p8 }
  0x2a   : > { %p2390_p9 = por %p2389_p7, %p2388_p5 }
  0x2b   : > { %p2384_p2 = pneg %p2383_p0 }
  0x2d   : > { %p2391_p4 = pnand %p2390_p9, %p2384_p2 }
  0x2f   : > { %2394 = shalt.err (!%p2391_p4)
}
  0x30   : > { %2168 = dma.hbm_to_vmem [thread:$0]  (!%p2934_p6), %s3555_s1, 16, %s2921_s26, [#allocation7]  }
  0x31   : > { %s3557_s3 = sld [smem:[#allocation36_spill]] }
  0x37   : > { %s2395_s13 = scalar_lea.hbm %s3557_s3, 64 }
  0x38   : > { %p2396_p10 = scmp.ne.s32.totalorder %s3557_s3, %s2395_s13  ;;  %p2402_p4 = scmp.lt.u32.totalorder %s2395_s13, %s3557_s3 }
  0x3a   : > { %p2398_p11 = pnand %p2396_p10, %p2948_p8 }
  0x3c   : > { %p2399_p12 = pneg %p2398_p11 }
  0x3e   : > { %p2404_p13 = pnand %p2402_p4, %p2399_p12 }
  0x40   : > { %2407 = shalt.err (!%p2404_p13)
}
  0x41   : > { %s2408_s26 = scalar_lea.vmem %s2930_s30, 64  ;;  %p2416_p7 = scmp.lt.s32.totalorder %s2930_s30, %s2930_s30 }
  0x42   : > { %p2409_p0 = scmp.ne.s32.totalorder %s2930_s30, %s2408_s26  ;;  %p2417_p9 = scmp.lt.s32.totalorder %s2408_s26, %s2408_s26 }
  0x44   : > { %p2411_p2 = pnand %p2409_p0, %p2948_p8  ;;  %p2418_p10 = por %p2417_p9, %p2416_p7 }
  0x46   : > { %p2412_p5 = pneg %p2411_p2 }
  0x48   : > { %p2419_p11 = pnand %p2418_p10, %p2412_p5 }
  0x4a   : > { %2422 = shalt.err (!%p2419_p11)
}
  0x4b   : > { %2174 = dma.hbm_to_vmem [thread:$0]  (!%p2934_p6), %s3557_s3, 64, %s2930_s30, [#allocation10]  }
  0x4c   : > { %s2423_s20 = scalar_lea.hbm %s3530_s5, 1024 }
  0x4d   : > { %p2424_p12 = scmp.ne.s32.totalorder %s3530_s5, %s2423_s20  ;;  %p2430_p0 = scmp.lt.u32.totalorder %s2423_s20, %s3530_s5 }
  0x4f   : > { %p2426_p4 = pnand %p2424_p12, %p2948_p8 }
  0x51   : > { %p2427_p13 = pneg %p2426_p4 }
  0x53   : > { %p2432_p2 = pnand %p2430_p0, %p2427_p13 }
  0x55   : > { %2435 = shalt.err (!%p2432_p2)
}
  0x56   : > { %s2436_s30 = scalar_lea.vmem %s2938_s14, 1024  ;;  %p2444_p10 = scmp.lt.s32.totalorder %s2938_s14, %s2938_s14 }
  0x57   : > { %p2437_p5 = scmp.ne.s32.totalorder %s2938_s14, %s2436_s30  ;;  %p2445_p11 = scmp.lt.s32.totalorder %s2436_s30, %s2436_s30 }
  0x59   : > { %p2439_p7 = pnand %p2437_p5, %p2948_p8  ;;  %p2446_p12 = por %p2445_p11, %p2444_p10 }
  0x5b   : > { %p2440_p9 = pneg %p2439_p7 }
  0x5d   : > { %p2447_p4 = pnand %p2446_p12, %p2440_p9 }
  0x5f   : > { %2450 = shalt.err (!%p2447_p4)
}
  0x60   : > { %s2800_s26 = smov 128   ;;  %s2801_s12 = smov 8  }
  0x61   : > { %2180 = dma.hbm_to_vmem [thread:$0]  (!%p2934_p6), %s3530_s5, 1024, %s2938_s14, [#allocation13], %s2800_s26, %s2800_s26, %s2801_s12  }
  0x62   : > { %s2802_s19 = smov [#allocation15]   ;;  %s2803_s29 = smov [#allocation18]  }
  0x63   : > { %s407_s20 = sshll.u32 %s2802_s19, 4  ;;  %s429_s13 = sshll.u32 %s2803_s29, 4  ;;  %s408_s20 = int_to_ptr.vmem [resolvable:$true] %s407_s20  ;;  %s430_s13 = int_to_ptr.vmem [resolvable:$true] %s429_s13 }
  0x64   : > { %s2451_s30 = scalar_lea.hbm %s3532_s7, 16 }
  0x65   : > { %p2452_p13 = scmp.ne.s32.totalorder %s3532_s7, %s2451_s30  ;;  %p2458_p5 = scmp.lt.u32.totalorder %s2451_s30, %s3532_s7 }
  0x67   : > { %p2454_p0 = pnand %p2452_p13, %p2948_p8 }
  0x69   : > { %p2455_p2 = pneg %p2454_p0 }
  0x6b   : > { %p2460_p7 = pnand %p2458_p5, %p2455_p2 }
  0x6d   : > { %2463 = shalt.err (!%p2460_p7)
}
  0x6e   : > { %s2464_s14 = scalar_lea.vmem %s408_s20, 16  ;;  %s2471_s26 = scalar_lea.vmem %s408_s20, 32 }
  0x6f   : > { %p2465_p9 = scmp.ne.s32.totalorder %s408_s20, %s2464_s14  ;;  %p2472_p12 = scmp.lt.s32.totalorder %s408_s20, %s408_s20 }
  0x70   : > { %p2473_p4 = scmp.lt.s32.totalorder %s2471_s26, %s2464_s14 }
  0x71   : > { %p2467_p10 = pnand %p2465_p9, %p2948_p8 }
  0x72   : > { %p2474_p1 = por %p2473_p4, %p2472_p12 }
  0x73   : > { %p2468_p11 = pneg %p2467_p10 }
  0x75   : > { %p2475_p3 = pnand %p2474_p1, %p2468_p11 }
  0x77   : > { %2478 = shalt.err (!%p2475_p3)
}
  0x78   : > { %2186 = dma.hbm_to_vmem [thread:$0]  (!%p2934_p6), %s3532_s7, 16, %s408_s20, [#allocation16]  }
  0x79   : > { %s2479_s12 = scalar_lea.hbm %s3534_s9, 16 }
  0x7a   : > { %p2480_p13 = scmp.ne.s32.totalorder %s3534_s9, %s2479_s12  ;;  %p2486_p3 = scmp.lt.u32.totalorder %s2479_s12, %s3534_s9 }
  0x7c   : > { %p2482_p0 = pnand %p2480_p13, %p2948_p8 }
  0x7e   : > { %p2483_p1 = pneg %p2482_p0 }
  0x80   : > { %p2488_p2 = pnand %p2486_p3, %p2483_p1 }
  0x82   : > { %2491 = shalt.err (!%p2488_p2)
}
  0x83   : > { %s2492_s16 = scalar_lea.vmem %s430_s13, 16  ;;  %s2499_s20 = scalar_lea.vmem %s430_s13, 32 }
  0x84   : > { %p2493_p5 = scmp.ne.s32.totalorder %s430_s13, %s2492_s16  ;;  %p2500_p10 = scmp.lt.s32.totalorder %s430_s13, %s430_s13 }
  0x85   : > { %p2501_p11 = scmp.lt.s32.totalorder %s2499_s20, %s2492_s16 }
  0x86   : > { %p2495_p7 = pnand %p2493_p5, %p2948_p8 }
  0x87   : > { %p2502_p12 = por %p2501_p11, %p2500_p10 }
  0x88   : > { %p2496_p9 = pneg %p2495_p7 }
  0x8a   : > { %p2503_p4 = pnand %p2502_p12, %p2496_p9 }
  0x8c   : > { %2506 = shalt.err (!%p2503_p4)
}
  0x8d   : > { %2192 = dma.hbm_to_vmem [thread:$0]  (!%p2934_p6), %s3534_s9, 16, %s430_s13, [#allocation19]  }
  0x8e   : > { %s2804_s14 = smov [#allocation8]   ;;  %s2507_s0 = scalar_lea.hbm %s3527_s2, 256 }
  0x8f   : > { %s345_s26 = sshll.u32 %s2804_s14, 4  ;;  %p2508_p13 = scmp.ne.s32.totalorder %s3527_s2, %s2507_s0  ;;  %s346_s26 = int_to_ptr.vmem [resolvable:$true] %s345_s26 }
  0x90   : > { %p2514_p3 = scmp.lt.u32.totalorder %s2507_s0, %s3527_s2 }
  0x91   : > { %p2510_p0 = pnand %p2508_p13, %p2948_p8 }
  0x93   : > { %p2511_p1 = pneg %p2510_p0 }
  0x95   : > { %p2516_p2 = pnand %p2514_p3, %p2511_p1 }
  0x97   : > { %2519 = shalt.err (!%p2516_p2)
}
  0x98   : > { %s2520_s13 = scalar_lea.vmem %s346_s26, 256  ;;  %p2528_p10 = scmp.lt.s32.totalorder %s346_s26, %s346_s26 }
  0x99   : > { %p2521_p5 = scmp.ne.s32.totalorder %s346_s26, %s2520_s13  ;;  %p2529_p11 = scmp.lt.s32.totalorder %s2520_s13, %s2520_s13 }
  0x9b   : > { %p2523_p7 = pnand %p2521_p5, %p2948_p8  ;;  %p2530_p12 = por %p2529_p11, %p2528_p10 }
  0x9d   : > { %p2524_p9 = pneg %p2523_p7 }
  0x9f   : > { %p2531_p4 = pnand %p2530_p12, %p2524_p9 }
  0xa1   : > { %2534 = shalt.err (!%p2531_p4)
}
  0xa2   : > { %s2805_s19 = smov 64   ;;  %s2806_s29 = smov 4  }
  0xa3   : > { %2171 = dma.hbm_to_vmem [thread:$0]  (!%p2934_p6), %s3527_s2, 256, %s346_s26, [#allocation7], %s2805_s19, %s2805_s19, %s2806_s29  }
  0xa4   : > { %s2807_s17 = smov [#allocation11]   ;;  %s2808_s14 = smov [#allocation14]  }
  0xa5   : > { %s370_s30 = sshll.u32 %s2807_s17, 4  ;;  %s393_s1 = sshll.u32 %s2808_s14, 4  ;;  %s371_s30 = int_to_ptr.vmem [resolvable:$true] %s370_s30  ;;  %s3073_s1 = int_to_ptr.vmem [resolvable:$true] %s393_s1 }
  0xa6   : > { %s2535_s27 = scalar_lea.hbm %s3529_s4, 16 }
  0xa7   : > { %p2536_p13 = scmp.ne.s32.totalorder %s3529_s4, %s2535_s27  ;;  %p2542_p3 = scmp.lt.u32.totalorder %s2535_s27, %s3529_s4 }
  0xa9   : > { %p2538_p0 = pnand %p2536_p13, %p2948_p8 }
  0xab   : > { %p2539_p1 = pneg %p2538_p0 }
  0xad   : > { %p2544_p2 = pnand %p2542_p3, %p2539_p1 }
  0xaf   : > { %2547 = shalt.err (!%p2544_p2)
}
  0xb0   : > { %s2548_s13 = scalar_lea.vmem %s371_s30, 16  ;;  %s2555_s16 = scalar_lea.vmem %s371_s30, 32 }
  0xb1   : > { %p2549_p5 = scmp.ne.s32.totalorder %s371_s30, %s2548_s13  ;;  %p2556_p10 = scmp.lt.s32.totalorder %s371_s30, %s371_s30 }
  0xb2   : > { %p2557_p11 = scmp.lt.s32.totalorder %s2555_s16, %s2548_s13 }
  0xb3   : > { %p2551_p7 = pnand %p2549_p5, %p2948_p8 }
  0xb4   : > { %p2558_p12 = por %p2557_p11, %p2556_p10 }
  0xb5   : > { %p2552_p9 = pneg %p2551_p7 }
  0xb7   : > { %p2559_p4 = pnand %p2558_p12, %p2552_p9 }
  0xb9   : > { %2562 = shalt.err (!%p2559_p4)
}
  0xba   : > { %2177 = dma.hbm_to_vmem [thread:$0]  (!%p2934_p6), %s3529_s4, 16, %s371_s30, [#allocation10]  }
  0xbb   : > { %s2563_s0 = scalar_lea.hbm %s3531_s6, 512 }
  0xbc   : > { %p2564_p13 = scmp.ne.s32.totalorder %s3531_s6, %s2563_s0  ;;  %p2570_p3 = scmp.lt.u32.totalorder %s2563_s0, %s3531_s6 }
  0xbe   : > { %p2566_p0 = pnand %p2564_p13, %p2948_p8 }
  0xc0   : > { %p2567_p1 = pneg %p2566_p0 }
  0xc2   : > { %p2572_p2 = pnand %p2570_p3, %p2567_p1 }
  0xc4   : > { %2575 = shalt.err (!%p2572_p2)
}
  0xc5   : > { %s2576_s30 = scalar_lea.vmem %s3073_s1, 512  ;;  %p2584_p10 = scmp.lt.s32.totalorder %s3073_s1, %s3073_s1 }
  0xc6   : > { %p2577_p5 = scmp.ne.s32.totalorder %s3073_s1, %s2576_s30  ;;  %p2585_p11 = scmp.lt.s32.totalorder %s2576_s30, %s2576_s30 }
  0xc8   : > { %p2579_p7 = pnand %p2577_p5, %p2948_p8  ;;  %p2586_p12 = por %p2585_p11, %p2584_p10 }
  0xca   : > { %p2580_p9 = pneg %p2579_p7 }
  0xcc   : > { %p2587_p4 = pnand %p2586_p12, %p2580_p9 }
  0xce   : > { %2590 = shalt.err (!%p2587_p4)
}
  0xcf   : > { %2183 = dma.hbm_to_vmem [thread:$0]  (!%p2934_p6), %s3531_s6, 512, %s3073_s1, [#allocation13], %s2805_s19, %s2805_s19, %s2806_s29  }
  0xd0   : > { %s2809_s16 = smov [#allocation17]   ;;  %s2810_s17 = smov [#allocation20]  }
  0xd1   : > { %s418_s20 = sshll.u32 %s2809_s16, 4  ;;  %s439_s14 = sshll.u32 %s2810_s17, 4  ;;  %s419_s20 = int_to_ptr.vmem [resolvable:$true] %s418_s20  ;;  %s3119_s14 = int_to_ptr.vmem [resolvable:$true] %s439_s14 }
  0xd2   : > { %s2591_s27 = scalar_lea.hbm %s3533_s8, 16 }
  0xd3   : > { %p2592_p13 = scmp.ne.s32.totalorder %s3533_s8, %s2591_s27  ;;  %p2598_p3 = scmp.lt.u32.totalorder %s2591_s27, %s3533_s8 }
  0xd5   : > { %p2594_p0 = pnand %p2592_p13, %p2948_p8 }
  0xd7   : > { %p2595_p1 = pneg %p2594_p0 }
  0xd9   : > { %p2600_p2 = pnand %p2598_p3, %p2595_p1 }
  0xdb   : > { %2603 = shalt.err (!%p2600_p2)
}
  0xdc   : > { %s2604_s30 = scalar_lea.vmem %s419_s20, 16  ;;  %s2611_s26 = scalar_lea.vmem %s419_s20, 32 }
  0xdd   : > { %p2605_p5 = scmp.ne.s32.totalorder %s419_s20, %s2604_s30  ;;  %p2612_p10 = scmp.lt.s32.totalorder %s419_s20, %s419_s20 }
  0xde   : > { %p2613_p11 = scmp.lt.s32.totalorder %s2611_s26, %s2604_s30 }
  0xdf   : > { %p2607_p7 = pnand %p2605_p5, %p2948_p8 }
  0xe0   : > { %p2614_p12 = por %p2613_p11, %p2612_p10 }
  0xe1   : > { %p2608_p9 = pneg %p2607_p7 }
  0xe3   : > { %p2615_p4 = pnand %p2614_p12, %p2608_p9 }
  0xe5   : > { %2618 = shalt.err (!%p2615_p4)
}
  0xe6   : > { %2189 = dma.hbm_to_vmem [thread:$0]  (!%p2934_p6), %s3533_s8, 16, %s419_s20, [#allocation16]  }
  0xe7   : > { %s2619_s0 = scalar_lea.hbm %s3535_s10, 512 }
  0xe8   : > { %p2620_p13 = scmp.ne.s32.totalorder %s3535_s10, %s2619_s0  ;;  %p2626_p3 = scmp.lt.u32.totalorder %s2619_s0, %s3535_s10 }
  0xea   : > { %p2622_p0 = pnand %p2620_p13, %p2948_p8 }
  0xec   : > { %p2623_p1 = pneg %p2622_p0 }
  0xee   : > { %p2628_p2 = pnand %p2626_p3, %p2623_p1 }
  0xf0   : > { %2631 = shalt.err (!%p2628_p2)
}
  0xf1   : > { %s2632_s20 = scalar_lea.vmem %s3119_s14, 512  ;;  %p2640_p10 = scmp.lt.s32.totalorder %s3119_s14, %s3119_s14 }
  0xf2   : > { %p2633_p5 = scmp.ne.s32.totalorder %s3119_s14, %s2632_s20  ;;  %p2641_p11 = scmp.lt.s32.totalorder %s2632_s20, %s2632_s20 }
  0xf4   : > { %p2635_p7 = pnand %p2633_p5, %p2948_p8  ;;  %p2642_p12 = por %p2641_p11, %p2640_p10 }
  0xf6   : > { %p2636_p9 = pneg %p2635_p7 }
  0xf8   : > { %p2643_p4 = pnand %p2642_p12, %p2636_p9 }
  0xfa   : > { %2646 = shalt.err (!%p2643_p4)
}
  0xfb   : > { %2195 = dma.hbm_to_vmem [thread:$0]  (!%p2934_p6), %s3535_s10, 512, %s3119_s14, [#allocation19], %s2805_s19, %s2805_s19, %s2806_s29  }
  0xfc   : > { %s2811_s26 = smov [#allocation21]   ;;  %s2647_s3 = scalar_lea.hbm %s3536_s11, 16 }
  0xfd   : > { %s453_s13 = sshll.u32 %s2811_s26, 4  ;;  %p2648_p13 = scmp.ne.s32.totalorder %s3536_s11, %s2647_s3  ;;  %s454_s13 = int_to_ptr.vmem [resolvable:$true] %s453_s13 }
  0xfe   : > { %p2654_p3 = scmp.lt.u32.totalorder %s2647_s3, %s3536_s11 }
  0xff   : > { %p2650_p0 = pnand %p2648_p13, %p2948_p8 }
 0x101   : > { %p2651_p1 = pneg %p2650_p0 }
 0x103   : > { %p2656_p2 = pnand %p2654_p3, %p2651_p1 }
 0x105   : > { %2659 = shalt.err (!%p2656_p2)
}
 0x106   : > { %s2660_s19 = scalar_lea.vmem %s454_s13, 16  ;;  %s2667_s29 = scalar_lea.vmem %s454_s13, 32 }
 0x107   : > { %p2661_p5 = scmp.ne.s32.totalorder %s454_s13, %s2660_s19  ;;  %p2668_p10 = scmp.lt.s32.totalorder %s454_s13, %s454_s13 }
 0x108   : > { %p2669_p11 = scmp.lt.s32.totalorder %s2667_s29, %s2660_s19 }
 0x109   : > { %p2663_p7 = pnand %p2661_p5, %p2948_p8 }
 0x10a   : > { %p2670_p12 = por %p2669_p11, %p2668_p10 }
 0x10b   : > { %p2664_p9 = pneg %p2663_p7 }
 0x10d   : > { %p2671_p4 = pnand %p2670_p12, %p2664_p9 }
 0x10f   : > { %2674 = shalt.err (!%p2671_p4)
}
 0x110   : > { %s3558_s25 = sld [smem:[#allocation32_spill]]  ;;  %s1935_s20 = sadd.s32 4294967294, %s2795_s24  }
 0x111   : > { %2198 = dma.hbm_to_vmem [thread:$0]  (!%p2934_p6), %s3536_s11, 16, %s454_s13, [#allocation22]  }
 0x112   : > { %s3185_s15 = sadd.s32 1, %s2795_s24   ;;  %s41_s1 = sadd.s32 1, %s2791_s23 }
 0x113   : > { %s38_s30 = ssub.s32 %s2795_s24, %s3185_s15  ;;  %p48_p8 = scmp.ne.s32.totalorder %s2791_s23, %s2787_s22 }
 0x114   : > { %p39_p13 = scmp.eq.s32.totalorder %s38_s30, 0  ;;  %p49_p0 = scmp.eq.s32.totalorder %s2795_s24, 0 }
 0x115   : > { %p54_p1 = scmp.ne.s32.totalorder %s2787_s22, %s2783_s21  ;;  %p315_p9 = scmp.eq.s32.totalorder %s1935_s20, 1 }
 0x116   : > { %p309_p3 = scmp.eq.s32.totalorder %s3558_s25, 1  ;;  %p50_p2 = por %p49_p0, %p48_p8 }
 0x117   : > { %s3197_s26 = scalar_select %p39_p13, %s2791_s23, %s41_s1  }
 0x118   : > { %p3559_p5 = scmp.eq.s32.totalorder %s3558_s25, 0  ;;  %p3205_p6 = por %p309_p3, %p48_p8 }
 0x119   : > { %p2218_p10 = scmp.lt.s32.totalorder %s2795_s24, 2  ;;  %s464_s17 = sand.u32 1, %s2791_s23  }
 0x11a   : > { %p3201_p7 = por %p3559_p5, %p54_p1  ;;  %p3211_p11 = por %p315_p9, %p54_p1 }
 0x11b   : > { %s3561_s13 = scalar_select %p3205_p6, 1, 0 }
 0x11c   : > { %s3562_s3 = scalar_select %p3211_p11, 1, 0 }
 0x11d   : > { %s1949_s0 = sshll.u32 %s464_s17, 3  ;;  %s1950_s27 = sshll.u32 %s2795_s24, 7 }
 0x11e   : > { %s3563_s19 = sld [smem:[#allocation34_spill]]  ;;  %s468_s14 = scalar_lea.vmem [#allocation3], %s1949_s0 }
 0x11f   : > { %s475_s18 = sshll.u32 %s468_s14, 4  ;;  %p3221_p12 = pnand %p2218_p10, %p50_p2  ;;  %s3225_s18 = int_to_ptr.vmem [resolvable:$true] %s475_s18 }
 0x120   : > { %s465_s20 = scalar_lea.sflag [#allocation4], %s464_s17 }
 0x121   : > { %p2677_p8 = pneg %p3221_p12 }
 0x124   : > { %s3219_s29 = scalar_lea.hbm %s3563_s19, %s1950_s27  ;;  %s2680_s27 = scalar_lea.hbm %s3563_s19, 256 }
 0x125   : > { %s2675_s1 = scalar_lea.hbm %s3219_s29, 128  ;;  %p2681_p1 = scmp.lt.u32.totalorder %s3219_s29, %s3563_s19 }
 0x126   : > { %p2676_p4 = scmp.ne.s32.totalorder %s3219_s29, %s2675_s1  ;;  %p2682_p3 = scmp.lt.u32.totalorder %s2680_s27, %s2675_s1 }
 0x127   : > { %p2684_p5 = scmp.lt.u32.totalorder %s2675_s1, %s3219_s29 }
 0x128   : > { %p2678_p13 = pnand %p2677_p8, %p2676_p4  ;;  %p2683_p2 = por %p2682_p3, %p2681_p1 }
 0x12a   : > { %p2679_p0 = pneg %p2678_p13  ;;  %p2685_p9 = por %p2684_p5, %p2683_p2 }
 0x12c   : > { %p2686_p10 = pnand %p2685_p9, %p2679_p0 }
 0x12e   : > { %2689 = shalt.err (!%p2686_p10)
}
 0x12f   : > { %s2690_s17 = scalar_lea.vmem %s3225_s18, 128  ;;  %s2812_s14 = smov [#allocation3]  }
 0x130   : > { %p2691_p4 = scmp.ne.s32.totalorder %s3225_s18, %s2690_s17  ;;  %s2695_s30 = sshll.u32 %s2812_s14, 4  ;;  %s2696_s30 = int_to_ptr.vmem [resolvable:$false] %s2695_s30 }
 0x131   : > { %s2697_s0 = scalar_lea.vmem %s2696_s30, 256  ;;  %p2698_p6 = scmp.lt.s32.totalorder %s3225_s18, %s2696_s30 }
 0x132   : > { %p2693_p13 = pnand %p2691_p4, %p2677_p8  ;;  %p2699_p1 = scmp.lt.s32.totalorder %s2697_s0, %s2690_s17 }
 0x134   : > { %p2694_p11 = pneg %p2693_p13  ;;  %p2700_p3 = por %p2699_p1, %p2698_p6 }
 0x136   : > { %p2701_p2 = pnand %p2700_p3, %p2694_p11 }
 0x138   : > { %2704 = shalt.err (!%p2701_p2)
}
 0x139   : > { %2202 = dma.hbm_to_vmem [thread:$0]  (!%p3221_p12), %s3219_s29, 128, %s3225_s18, %s465_s20  }
 0x13a   : > { %s3565_s1 = sld [smem:[#allocation33_spill]] }
 0x140   : > { %p3566_p0 = scmp.ne.s32.totalorder %s3565_s1, 0 }
 0x141   : > { %s3255_s27 = sand.u32 (!%p3566_p0), 1, %s2787_s22  }
 0x142   : > { %484 = sbr.rel (%p3566_p0) target bundleno = 3435 (0xd6b), region = 68  ;;  %s1952_s12 = sshll.u32 (!%p3566_p0), %s3255_s27, 3 }
 0x143   : > { %s487_s28 = scalar_lea.sflag (!%p3566_p0), [#allocation4], %s3255_s27  ;;  %s3261_s17 = scalar_lea.vmem (!%p3566_p0), [#allocation3], %s1952_s12 }
 0x149   : > { %2750 = dma.done.wait (%p3201_p7), %s487_s28, 128  }
 0x14a   : > { %2752 = vsyncadd (%p3201_p7), %s487_s28, 4294967168  ;;  %s3567_s29 = sld [smem:[#allocation32_spill]] }
 0x150   : > { %p3568_p6 = scmp.eq.s32.totalorder %s3567_s29, 0 }
 0x152   : > { %2754 = dma.done.wait (%p3568_p6), [#allocation7], 272   ;;  %p3569_p11 = pmov %p3568_p6 }
 0x153   : > { %p3570_p12 = pmov %p3568_p6 }
 0x154   : > { %2756 = vsyncadd (%p3569_p11), [#allocation7], 4294967024 }
 0x155   : > { %2758 = dma.done.wait (%p3570_p12), [#allocation10], 80   ;;  %p3571_p8 = pmov %p3568_p6 }
 0x156   : > { %p3572_p5 = pmov %p3568_p6 }
 0x157   : > { %2760 = vsyncadd (%p3571_p8), [#allocation10], 4294967216 }
 0x158   : > { %2762 = dma.done.wait (%p3572_p5), [#allocation13], 1536   ;;  %p3573_p9 = pmov %p3572_p5 }
 0x159   : > { %p3574_p7 = pmov %p3572_p5 }
 0x15a   : > { %2764 = vsyncadd (%p3573_p9), [#allocation13], 4294965760 }
 0x15b   : > { %2766 = dma.done.wait (%p3574_p7), [#allocation16], 32   ;;  %p3575_p10 = pmov %p3572_p5 }
 0x15c   : > { %p3576_p4 = pmov %p3572_p5 }
 0x15d   : > { %2768 = vsyncadd (%p3575_p10), [#allocation16], 4294967264 }
 0x15e   : > { %2770 = dma.done.wait (%p3576_p4), [#allocation19], 528   ;;  %p3577_p13 = pmov %p3576_p4 }
 0x15f   : > { %p3578_p1 = pmov %p3576_p4 }
 0x160   : > { %2772 = vsyncadd (%p3577_p13), [#allocation19], 4294966768 }
 0x161   : > { %2774 = dma.done.wait (%p3578_p1), [#allocation22], 16   ;;  %p3579_p3 = pmov %p3578_p1 }
 0x162   : > { %vm578_vm0 = vcmask 261120   ;;  %v576_v0 = vld [vmem:[%s3261_s17] sm:$0xff]  ;;  %v2298_v7 = vld [vmem:[#allocation8] sm:$0xff]   ;;  %v2813_v8 = vmov 0.0   ;;  %vm2814_vm1 = vmmov 0   ;;  %v2815_v26 = vmov 0  }
 0x163   : > { %2776 = vsyncadd (%p3579_p3), [#allocation22], 4294967280  ;;  %v579_v1 = vsel %vm578_vm0, %v576_v0, 0.0  ;;  %2037 = vmatprep.subr.bf16.mxu0 %v2813_v8  ;;  %2041 = vmatprep.mubr.msk.bf16.mxu0 %vm2814_vm1, %v2813_v8  ;;  %v2299_v9 = vld [vmem:[#allocation8 + $0x8] sm:$0xff]   ;;  %v1965_v14 = vld [vmem:[#allocation6] ss:$0 sm:$0xff]  ;;  %v660_v31 = vlaneseq }
 0x164   : > { %580 = vadd.xlane.f32.xlu0 %v579_v1  ;;  %2038 = vmatpush3.bf16.msra.mxu0 %v2298_v7  ;;  %v2300_v17 = vld [vmem:[#allocation14] sm:$0xff]   ;;  %v2301_v19 = vld [vmem:[#allocation14 + $0x8] sm:$0xff]   ;;  %v2302_v20 = vld [vmem:[#allocation14 + $0x10] sm:$0xff]   ;;  %vm767_vm3 = vcmask 523264   ;;  %vm1111_vm6 = vcmask 1043456   ;;  %s2816_s16 = smov 64  }
 0x165   : > { %2039 = vmatprep.subr.bf16.mxu0 %v2813_v8  ;;  %v2303_v21 = vld [vmem:[#allocation14 + $0x18] sm:$0xff]   ;;  %v2304_v22 = vld [vmem:[#allocation12 + $0x4] ss:$8 sps:$4 sm:$0xff]   ;;  %v2306_v23 = vld [vmem:[#allocation12] ss:$8 sps:$4 sm:$0xff]   ;;  %803 = vmatprep.mubr.bf16.mxu1 %v2815_v26  ;;  %v3308_v32 = vshrl.u32 %v660_v31, 7 }
 0x166   : > { %v2307_v24 = vld [vmem:[#allocation12 + $0x14] ss:$8 sps:$4 sm:$0xff]   ;;  %771 = vmatprep.subr.bf16.mxu1 %v2304_v22  ;;  %v2309_v25 = vld [vmem:[#allocation12 + $0x10] ss:$8 sps:$4 sm:$0xff]   ;;  %v2310_v27 = vld [vmem:[#allocation12 + $0x24] ss:$8 sps:$4 sm:$0xff]  }
 0x167   : > { %772 = vmatpush1.bf16.msra.mxu1 %v2306_v23  ;;  %v2312_v28 = vld [vmem:[#allocation12 + $0x20] ss:$8 sps:$4 sm:$0xff]   ;;  %v2313_v29 = vld [vmem:[#allocation12 + $0x34] ss:$8 sps:$4 sm:$0xff]   ;;  %v2315_v30 = vld [vmem:[#allocation12 + $0x30] ss:$8 sps:$4 sm:$0xff]  }
 0x168   : > { %2040 = vmatpush3.bf16.msra.mxu0 %v2299_v9  ;;  %773 = vmatprep.subr.bf16.mxu1 %v2307_v24  ;;  %v1969_v33 = vld [vmem:[#allocation9 + $0x3] ss:$0 sm:$0xff]  ;;  %vm677_vm2 = vcmp.ge.s32.totalorder %v3308_v32, 1  ;;  %v1970_v35 = vld [vmem:[#allocation11] ss:$0 sm:$0xff]  ;;  %vm689_vm4 = vcmp.ge.s32.totalorder %v3308_v32, 2 }
 0x169   : > { %2045 = vmatprep.subr.bf16.mxu0 %v2813_v8  ;;  %v1971_v41 = vld [vmem:[#allocation9 + $0x2] ss:$0 sm:$0xff]  ;;  %vm701_vm5 = vcmp.ge.s32.totalorder %v3308_v32, 3  ;;  %v1972_v48 = vld [vmem:[#allocation9 + $0x1] ss:$0 sm:$0xff]  ;;  %s2817_s18 = smov 124  }
 0x16a   : > { %v1973_v51 = vld [vmem:[#allocation9] ss:$0 sm:$0xff]  ;;  %s2818_s25 = smov 4   ;;  %s2819_s20 = smov 32   ;;  %vm932_vm7 = vcmp.ge.s32.totalorder %v3308_v32, 4  ;;  %vm1047_vm8 = vcmask 130048  }
 0x16b   : > { %774 = vmatpush1.bf16.msra.mxu1 %v2309_v25  ;;  %s2820_s14 = smov 16   ;;  %s2821_s30 = smov 80   ;;  %vm1034_vm10 = vcmask 64512   ;;  %vm1333_vm11 = vcmask 261248   ;;  %vm1489_vm12 = vcmask 392448   ;;  %vm1645_vm13 = vcmask 523648  }
 0x16c   : > { %775 = vmatprep.subr.bf16.mxu1 %v2310_v27  ;;  %s2822_s0 = smov 48   ;;  %s2823_s1 = smov 112  }
 0x16d   : > { %s2824_s28 = smov 96   ;;  %p3581_p0 = scmp.ne.s32.totalorder %s3561_s13, 0 }
 0x16f   : > { %776 = vmatpush1.bf16.msra.mxu1 %v2312_v28 }
 0x170   : > { %777 = vmatprep.subr.bf16.mxu1 %v2313_v29 }
 0x173   : > { %778 = vmatpush1.bf16.msra.mxu1 %v2315_v30 }
 0x174   : > { %2057 = vmatprep.subr.bf16.mxu1 %v2813_v8 }
 0x1f1   : > { %v581_v2 = vpop.xlane.xlu0 %580 }
 0x1f2   : > { %v583_v3 = vmul.f32 0.03125, %v581_v2 }
 0x1f4   : > { %v584_v4 = vsub.f32 %v576_v0, %v583_v3 }
 0x1f6   : > { %v585_v5 = vmul.f32 %v584_v4, %v584_v4 }
 0x1f8   : > { %v586_v6 = vsel %vm578_vm0, %v585_v5, 0.0 }
 0x1f9   : > { %587 = vadd.xlane.f32.xlu0 %v586_v6 }
 0x286   : > { %v588_v10 = vpop.xlane.xlu0 %587 }
 0x287   : > { %v589_v11 = vmul.f32 0.03125, %v588_v10 }
 0x289   : > { %v590_v12 = vadd.f32 1e-05, %v589_v11  ;;  %v1988_v11 = vld [vmem:[#allocation15] ss:$0 sm:$0xff] }
 0x28b   : > { %2320 = vrsqrt.f32 %v590_v12 }
 0x295   : > { %v2321_v13 = vpop.eup %2320 }
 0x296   : > { %v592_v15 = vmul.f32 %v2321_v13, %v584_v4 }
 0x298   : > { %v599_v16 = vmul.f32 %v1965_v14, %v592_v15 }
 0x29a   : > { %v600_v18 = vpack.c.bf16 %v599_v16, %v599_v16 }
 0x29c   : > { %2042 = vmatmul.mubr.msk.bf16.vlgmr.msra.gmra.mrb[0].mxu0 %vm578_vm0, %v600_v18 }
 0x29d   : > { %2046 = vmatpush3.bf16.msra.mxu0 %v2300_v17  ;;  %2053 = vmatprep.mubr.msk.bf16.mxu0 %vm2814_vm1, %v2813_v8 }
 0x29e   : > { %2047 = vmatprep.subr.bf16.mxu0 %v2813_v8 }
 0x2a1   : > { %2048 = vmatpush3.bf16.msra.mxu0 %v2301_v19 }
 0x2a2   : > { %2049 = vmatprep.subr.bf16.mxu0 %v2813_v8 }
 0x2a5   : > { %2050 = vmatpush3.bf16.msra.mxu0 %v2302_v20 }
 0x2a6   : > { %2051 = vmatprep.subr.bf16.mxu0 %v2813_v8 }
 0x2a9   : > { %2052 = vmatpush3.bf16.msra.mxu0 %v2303_v21 }
 0x2aa   : > { %2063 = vmatprep.subr.bf16.mxu0 %v2813_v8 }
 0x36f   : > { %v3310_v34 = vpop.f32.mrb[0].mxu0 }
 0x370   : > { %v667_v36 = vmul.f32 %v1969_v33, %v3310_v34  ;;  %v676_v37 = vrot.slane %v3310_v34, 7  ;;  %v688_v38 = vrot.slane %v3310_v34, 6  ;;  %v700_v39 = vrot.slane %v3310_v34, 5  ;;  %v2043_v40 = vpop.f32.mrb[1].mxu0 }
 0x371   : > { %v657_v42 = vpop.f32.mrb[2].mxu0  ;;  %v812_v43 = vpack.c.bf16 %v3310_v34, %v3310_v34  ;;  %v2825_v40 = vmov 4  }
 0x372   : > { %v680_v44 = vsel %vm677_vm2, %v676_v37, 0.0  ;;  %v2044_v45 = vpop.f32.mrb[3].mxu0  ;;  %v675_v46 = vadd.f32 %v1970_v35, %v667_v36  ;;  %v692_v47 = vsel %vm689_vm4, %v688_v38, 0.0  ;;  %v704_v50 = vsel %vm701_vm5, %v700_v39, 0.0  ;;  %2294 = vset.pattern.permute.xlu0 %v2825_v40 }
 0x373   : > { %2054 = vmatmul.mubr.msk.bf16.vlgmr.msra.gmra.mrb[4].mxu0 %vm767_vm3, %v812_v43  ;;  %v686_v49 = vmul.f32 %v1971_v41, %v680_v44  ;;  %v698_v53 = vmul.f32 %v1972_v48, %v692_v47  ;;  %v710_v55 = vmul.f32 %v1973_v51, %v704_v50  ;;  %v2826_v41 = vmov 5  }
 0x374   : > { %2065 = vmatprep.mubr.msk.bf16.mxu0 %vm2814_vm1, %v2813_v8  ;;  %2295 = vset.pattern.permute.xlu1 %v2826_v41 }
 0x375   : > { %v687_v52 = vadd.f32 %v686_v49, %v675_v46 }
 0x377   : > { %v699_v54 = vadd.f32 %v698_v53, %v687_v52 }
 0x379   : > { %v711_v56 = vadd.f32 %v710_v55, %v699_v54 }
 0x37b   : > { %v712_v57 = vsub.f32 0.0, %v711_v56 }
 0x37d   : > { %v713_v58 = vmul.f32 1.442695, %v712_v57 }
 0x37f   : > { %2322 = vpow2.f32 %v713_v58  ;;  %v2827_v58 = vmov 7  }
 0x389   : > { %v2323_v59 = vpop.eup %2322 }
 0x38a   : > { %v715_v60 = vadd.f32 1.0, %v2323_v59  ;;  %v2828_v59 = vmov 6  }
 0x38c   : > { %2324 = vrcp.f32 %v715_v60 }
 0x396   : > { %v2325_v61 = vpop.eup %2324 }
 0x397   : > { %v3328_v62 = vmul.f32 %v2325_v61, %v711_v56 }
 0x399   : > { %v718_v63 = vpack.c.bf16 %v3328_v62, %v3328_v62 }
 0x39b   : > { %1982 = vmatmul.mubr.msk.bf16.vlgmr.msra.gmra.mrb[0].mxu1 %vm767_vm3, %v718_v63 }
 0x39c   : > { %2059 = vmatprep.mubr.msk.bf16.mxu1 %vm2814_vm1, %v2813_v8 }
 0x446   : > { %v882_v0 = vpop.f32.mrb[4].mxu0 }
 0x447   : > { %v3335_v1 = vpack.c.bf16 %v882_v0, %v882_v0  ;;  %889 = vrot.lane.b32.xlu1 %v882_v0, %s2816_s16  ;;  %v2055_v2 = vpop.f32.mrb[5].mxu0 }
 0x448   : > { %v885_v3 = vpop.f32.mrb[6].mxu0 }
 0x449   : > { %v2056_v4 = vpop.f32.mrb[7].mxu0  ;;  %v1113_v5 = vsel %vm1111_vm6, %v3335_v1, 0 }
 0x44a   : > { %2064 = vmatpush3.bf16.msra.mxu0 %v1113_v5 }
 0x44b   : > { %2075 = vmatprep.subr.bf16.mxu0 %v2813_v8 }
 0x46e   : > { %v805_v6 = vpop.f32.mrb[0].mxu1 }
 0x46f   : > { %v807_v7 = vpop.f32.mrb[1].mxu1  ;;  %v1018_v26 = vmul.f32 0.25, %v805_v6  ;;  %v1042_v29 = vpack.c.bf16 %v805_v6, %v805_v6 }
 0x470   : > { %v809_v9 = vpop.f32.mrb[2].mxu1 }
 0x471   : > { %v810_v10 = vpop.f32.mrb[3].mxu1  ;;  %v1043_v28 = vpack.c.bf16 %v1018_v26, %v1018_v26 }
 0x4b9   : > { %v890_v12 = vpop.permute.xlu1 %889 }
 0x4ba   : > { %v892_v13 = vadd.f32 %v890_v12, %v807_v7 }
 0x4bc   : > { %v3341_v14 = vadd.f32 %v1988_v11, %v892_v13 }
 0x4be   : > { %v902_v15 = vand.u32 2147483647, %v3341_v14  ;;  %v901_v21 = vmin.f32 %v3341_v14, 0.0 }
 0x4c0   : > { %v903_v16 = vsub.f32 0.0, %v902_v15 }
 0x4c2   : > { %v904_v17 = vmul.f32 1.442695, %v903_v16 }
 0x4c4   : > { %2326 = vpow2.f32 %v904_v17 }
 0x4ce   : > { %v2327_v18 = vpop.eup %2326 }
 0x4cf   : > { %v906_v19 = vadd.f32 1.0, %v2327_v18 }
 0x4d1   : > { %2328 = vlog2.f32 %v906_v19 }
 0x4db   : > { %v2329_v20 = vpop.eup %2328 }
 0x4dc   : > { %v908_v22 = vmul.f32 0.6931472, %v2329_v20  ;;  %v1025_v20 = vsub.s32 0, %v3308_v32 }
 0x4de   : > { %v909_v23 = vsub.f32 %v901_v21, %v908_v22  ;;  %v1183_v21 = vsub.s32 1, %v3308_v32  ;;  %v1341_v22 = vsub.s32 2, %v3308_v32 }
 0x4e0   : > { %911 = vrot.lane.b32.xlu1 %v909_v23, %s2817_s18 }
 0x552   : > { %v912_v24 = vpop.permute.xlu1 %911 }
 0x553   : > { %v914_v25 = vrot.slane %v912_v24, 7  ;;  %v1015_v24 = vand.u32 127, %v660_v31 }
 0x555   : > { %v915_v27 = vsel %vm677_vm2, %v914_v25, 0.0  ;;  %vm1016_vm9 = vcmp.ge.s32.totalorder %v3308_v32, %v1015_v24 }
 0x556   : > { %917 = vrot.lane.b32.xlu0 %v915_v27, %s2818_s25 }
 0x55a   : > { %1359 = vrot.lane.b32.xlu0 %v1043_v28, %s2819_s20 }
 0x55e   : > { %1515 = vrot.lane.b32.xlu0 %v1043_v28, %s2820_s14 }
 0x562   : > { %1513 = vrot.lane.b32.xlu0 %v1042_v29, %s2821_s30 }
 0x5c8   : > { %v918_v30 = vpop.permute.xlu0 %917 }
 0x5c9   : > { %v920_v33 = vadd.f32 %v918_v30, %v909_v23  ;;  %v1497_v23 = vsub.s32 3, %v3308_v32 }
 0x5cb   : > { %922 = vrot.lane.b32.xlu1 %v920_v33, %s2817_s18 }
 0x5cc   : > { %v1360_v49 = vpop.permute.xlu0 %1359 }
 0x5cd   : > { %v1365_v51 = vsel %vm1047_vm8, %v1360_v49, 0 }
 0x5d0   : > { %v1516_v52 = vpop.permute.xlu0 %1515 }
 0x5d1   : > { %v1521_v54 = vsel %vm1047_vm8, %v1516_v52, 0 }
 0x5d4   : > { %v1514_v55 = vpop.permute.xlu0 %1513 }
 0x63d   : > { %v923_v35 = vpop.permute.xlu1 %922 }
 0x63e   : > { %v925_v36 = vrot.slane %v923_v35, 6 }
 0x640   : > { %v926_v37 = vsel %vm689_vm4, %v925_v36, 0.0 }
 0x641   : > { %928 = vrot.lane.b32.xlu1 %v926_v37, %s2818_s25 }
 0x6b3   : > { %v929_v38 = vpop.permute.xlu1 %928 }
 0x6b4   : > { %v931_v39 = vadd.f32 %v929_v38, %v920_v33 }
 0x6b6   : > { %934 = vrot.lane.b32.xlu1 %v931_v39, %s2817_s18 }
 0x6ba   : > { %1045 = vrot.lane.b32.xlu1 %v1043_v28, %s2816_s16 }
 0x6be   : > { %1202 = vrot.lane.b32.xlu1 %v1043_v28, %s2822_s0 }
 0x6c2   : > { %1200 = vrot.lane.b32.xlu1 %v1042_v29, %s2823_s1 }
 0x6c6   : > { %1357 = vrot.lane.b32.xlu1 %v1042_v29, %s2824_s28 }
 0x728   : > { %v935_v42 = vpop.permute.xlu1 %934 }
 0x729   : > { %v937_v43 = vrot.slane %v935_v42, 4 }
 0x72b   : > { %v940_v44 = vsel %vm932_vm7, %v937_v43, 0.0 }
 0x72c   : > { %942 = vrot.lane.b32.xlu1 %v940_v44, %s2818_s25  ;;  %v1046_v45 = vpop.permute.xlu1 %1045 }
 0x72d   : > { %v1052_v46 = vsel %vm1047_vm8, %v1046_v45, 0 }
 0x72e   : > { %2058 = vmatpush3.bf16.xpose.msra.mxu1 %v1052_v46 }
 0x72f   : > { %2069 = vmatprep.subr.bf16.mxu1 %v2813_v8 }
 0x730   : > { %v1203_v47 = vpop.permute.xlu1 %1202 }
 0x731   : > { %v1208_v48 = vsel %vm1047_vm8, %v1203_v47, 0 }
 0x734   : > { %v1201_v50 = vpop.permute.xlu1 %1200 }
 0x735   : > { %2060 = vmatmul.mubr.msk.bf16.vlgmr.msra.gmra.mrb[4].mxu1 %vm1047_vm8, %v1042_v29 }
 0x736   : > { %2070 = vmatpush3.bf16.xpose.msra.mxu1 %v1208_v48  ;;  %2071 = vmatprep.mubr.msk.bf16.mxu1 %vm2814_vm1, %v2813_v8 }
 0x737   : > { %2081 = vmatprep.subr.bf16.mxu1 %v2813_v8 }
 0x738   : > { %v1358_v53 = vpop.permute.xlu1 %1357 }
 0x73d   : > { %2072 = vmatmul.mubr.msk.bf16.vlgmr.msra.gmra.mrb[8].mxu1 %vm1047_vm8, %v1201_v50 }
 0x73e   : > { %2082 = vmatpush3.bf16.xpose.msra.mxu1 %v1365_v51  ;;  %2083 = vmatprep.mubr.msk.bf16.mxu1 %vm2814_vm1, %v2813_v8 }
 0x73f   : > { %2093 = vmatprep.subr.bf16.mxu1 %v2813_v8 }
 0x745   : > { %2084 = vmatmul.mubr.msk.bf16.vlgmr.msra.gmra.mrb[12].mxu1 %vm1047_vm8, %v1358_v53 }
 0x746   : > { %2094 = vmatpush3.bf16.xpose.msra.mxu1 %v1521_v54  ;;  %2095 = vmatprep.mubr.msk.bf16.mxu1 %vm2814_vm1, %v2813_v8 }
 0x747   : > { %2105 = vmatprep.subr.bf16.mxu1 %v2813_v8 }
 0x74d   : > { %2096 = vmatmul.mubr.msk.bf16.vlgmr.msra.gmra.mrb[16].mxu1 %vm1047_vm8, %v1514_v55 }
 0x74e   : > { %2113 = vmatprep.mubr.msk.bf16.mxu1 %vm2814_vm1, %v2813_v8 }
 0x79e   : > { %v943_v56 = vpop.permute.xlu1 %942 }
 0x79f   : > { %v945_v57 = vadd.f32 %v943_v56, %v931_v39 }
 0x7a1   : > { %1020 = vperm.xlu0 %2294, %v945_v57   ;;  %947 = vrot.lane.b32.xlu1 %v945_v57, %s2817_s18  ;;  %s574_s18 = scalar_lea.vmem [#allocation23], %s1952_s12  ;;  %s1747_s12 = scalar_lea.sflag [#allocation5], %s3255_s27 }
 0x7a2   : > { %s1760_s25 = sshll.u32 %s574_s18, 4  ;;  %s3482_s25 = int_to_ptr.vmem [resolvable:$true] %s1760_s25 }
 0x7a5   : > { %2297 = vset.pattern.permute.xlu0 %v2827_v58  ;;  %1178 = vperm.xlu1 %2295, %v945_v57  }
 0x7a6   : > { %1492 = vperm.xlu0 %2297, %v945_v57  }
 0x7a9   : > { %2296 = vset.pattern.permute.xlu1 %v2828_v59 }
 0x7aa   : > { %1336 = vperm.xlu1 %2296, %v945_v57  }
 0x7c4   : > { %982 = vxpose.xlu0.b32.start.end [1/1] (short) (narrow) %v3341_v14, 8 }
 0x808   : > { %v3385_v60 = vpop.f32.mrb[4].mxu1 }
 0x809   : > { %v2061_v61 = vpop.f32.mrb[5].mxu1 }
 0x80a   : > { %v1091_v63 = vpop.f32.mrb[6].mxu1 }
 0x80b   : > { %v2062_v0 = vpop.f32.mrb[7].mxu1 }
 0x810   : > { %v3387_v2 = vpop.f32.mrb[8].mxu1 }
 0x811   : > { %v2073_v3 = vpop.f32.mrb[9].mxu1 }
 0x812   : > { %v1247_v4 = vpop.f32.mrb[10].mxu1 }
 0x813   : > { %v2074_v5 = vpop.f32.mrb[11].mxu1  ;;  %v948_v6 = vpop.permute.xlu1 %947 }
 0x814   : > { %950 = vxpose.xlu1.b32.start.end [1/1] (short) (narrow) %v948_v6, 8 }
 0x818   : > { %v3389_v7 = vpop.f32.mrb[12].mxu1 }
 0x819   : > { %v2085_v9 = vpop.f32.mrb[13].mxu1 }
 0x81a   : > { %v1404_v10 = vpop.f32.mrb[14].mxu1 }
 0x81b   : > { %v2086_v11 = vpop.f32.mrb[15].mxu1 }
 0x820   : > { %v3391_v12 = vpop.f32.mrb[16].mxu1  ;;  %v1021_v16 = vpop.permute.xlu0 %1020 }
 0x821   : > { %v2097_v13 = vpop.f32.mrb[17].mxu1 }
 0x822   : > { %v1560_v14 = vpop.f32.mrb[18].mxu1 }
 0x823   : > { %v2098_v15 = vpop.f32.mrb[19].mxu1 }
 0x824   : > { %v1179_v17 = vpop.permute.xlu1 %1178 }
 0x825   : > { %v1493_v18 = vpop.permute.xlu0 %1492 }
 0x829   : > { %v1337_v19 = vpop.permute.xlu1 %1336 }
 0x844   : > { %v998_v25 = vpop.trf.xlu0 }
 0x845   : > { %v1190_v33 = vrot.slane %v998_v25, %v1183_v21  ;;  %v1032_v35 = vrot.slane %v998_v25, %v1025_v20  ;;  %v1348_v40 = vrot.slane %v998_v25, %v1341_v22  ;;  %v1504_v41 = vrot.slane %v998_v25, %v1497_v23 }
 0x894   : > { %v966_v26 = vpop.trf.xlu1 }
 0x895   : > { %v1026_v27 = vrot.slane %v966_v26, %v1025_v20  ;;  %v1184_v28 = vrot.slane %v966_v26, %v1183_v21  ;;  %v1342_v29 = vrot.slane %v966_v26, %v1341_v22  ;;  %v1498_v30 = vrot.slane %v966_v26, %v1497_v23 }
 0x897   : > { %v1185_v36 = vsub.f32 %v1179_v17, %v1184_v28  ;;  %v1027_v37 = vsub.f32 %v1021_v16, %v1026_v27  ;;  %v1343_v38 = vsub.f32 %v1337_v19, %v1342_v29  ;;  %v1499_v39 = vsub.f32 %v1493_v18, %v1498_v30 }
 0x899   : > { %v1186_v42 = vsel %vm1016_vm9, %v1185_v36, -1e+30  ;;  %v1028_v43 = vsel %vm1016_vm9, %v1027_v37, -1e+30  ;;  %v1344_v31 = vsel %vm1016_vm9, %v1343_v38, -1e+30 }
 0x89a   : > { %v1191_v44 = vadd.f32 %v1190_v33, %v1186_v42  ;;  %v1033_v45 = vadd.f32 %v1032_v35, %v1028_v43  ;;  %v1500_v46 = vsel %vm1016_vm9, %v1499_v39, -1e+30  ;;  %v1349_v32 = vadd.f32 %v1348_v40, %v1344_v31 }
 0x89b   : > { %v1505_v49 = vadd.f32 %v1504_v41, %v1500_v46 }
 0x89c   : > { %v1192_v47 = vsel %vm1034_vm10, %v1191_v44, -inf  ;;  %v1035_v48 = vsel %vm1034_vm10, %v1033_v45, -inf  ;;  %v1350_v50 = vsel %vm1034_vm10, %v1349_v32, -inf }
 0x89d   : > { %1193 = vmax.xlane.f32.xlu1 %v1192_v47  ;;  %1036 = vmax.xlane.f32.xlu0 %v1035_v48  ;;  %v1506_v51 = vsel %vm1034_vm10, %v1505_v49, -inf }
 0x8a1   : > { %1351 = vmax.xlane.f32.xlu1 %v1350_v50  ;;  %1507 = vmax.xlane.f32.xlu0 %v1506_v51 }
 0x92a   : > { %v1194_v52 = vpop.xlane.xlu1 %1193  ;;  %v1037_v53 = vpop.xlane.xlu0 %1036 }
 0x92b   : > { %v1195_v54 = vmax.f32 %v1194_v52, -80.0  ;;  %v1038_v55 = vmax.f32 %v1037_v53, -80.0 }
 0x92d   : > { %v1196_v56 = vsub.f32 %v1191_v44, %v1195_v54  ;;  %v1039_v57 = vsub.f32 %v1033_v45, %v1038_v55 }
 0x92e   : > { %v1352_v58 = vpop.xlane.xlu1 %1351  ;;  %v1508_v59 = vpop.xlane.xlu0 %1507 }
 0x92f   : > { %v1197_v61 = vmul.f32 1.442695, %v1196_v56  ;;  %v1040_v63 = vmul.f32 1.442695, %v1039_v57  ;;  %v1353_v0 = vmax.f32 %v1352_v58, -80.0  ;;  %v1509_v3 = vmax.f32 %v1508_v59, -80.0 }
 0x931   : > { %2330 = vpow2.f32 %v1197_v61  ;;  %v1354_v4 = vsub.f32 %v1349_v32, %v1353_v0  ;;  %v1510_v5 = vsub.f32 %v1505_v49, %v1509_v3  ;;  %v1568_v27 = vsub.f32 0.0, %v1509_v3 }
 0x932   : > { %2332 = vpow2.f32 %v1040_v63 }
 0x933   : > { %v1355_v6 = vmul.f32 1.442695, %v1354_v4  ;;  %v1511_v9 = vmul.f32 1.442695, %v1510_v5  ;;  %v1569_v37 = vmul.f32 1.442695, %v1568_v27 }
 0x935   : > { %2334 = vpow2.f32 %v1355_v6 }
 0x936   : > { %2336 = vpow2.f32 %v1511_v9 }
 0x93b   : > { %v2331_v10 = vpop.eup %2330 }
 0x93c   : > { %v3404_v11 = vmul.f32 %v2331_v10, %v3387_v2  ;;  %v2333_v13 = vpop.eup %2332 }
 0x93d   : > { %v1094_v15 = vmul.f32 %v2333_v13, %v3385_v60  ;;  %v1255_v60 = vsub.f32 0.0, %v1195_v54 }
 0x93e   : > { %v1251_v14 = vsel %vm1034_vm10, %v3404_v11, 0.0 }
 0x93f   : > { %1252 = vadd.xlane.f32.xlu0 %v1251_v14  ;;  %v2335_v16 = vpop.eup %2334  ;;  %v1095_v17 = vsel %vm1034_vm10, %v1094_v15, 0.0  ;;  %v1256_v22 = vmul.f32 1.442695, %v1255_v60 }
 0x940   : > { %1096 = vadd.xlane.f32.xlu1 %v1095_v17  ;;  %v3411_v18 = vmul.f32 %v2335_v16, %v3389_v7  ;;  %v2337_v19 = vpop.eup %2336  ;;  %v1099_v7 = vsub.f32 0.0, %v1038_v55 }
 0x941   : > { %v3416_v2 = vmul.f32 %v2337_v19, %v3391_v12  ;;  %2338 = vpow2.f32 %v1256_v22  ;;  %v1412_v12 = vsub.f32 0.0, %v1353_v0 }
 0x942   : > { %v1408_v20 = vsel %vm1034_vm10, %v3411_v18, 0.0  ;;  %v1100_v23 = vmul.f32 1.442695, %v1099_v7 }
 0x943   : > { %v1564_v21 = vsel %vm1034_vm10, %v3416_v2, 0.0  ;;  %v1413_v24 = vmul.f32 1.442695, %v1412_v12 }
 0x944   : > { %1409 = vadd.xlane.f32.xlu1 %v1408_v20  ;;  %1565 = vadd.xlane.f32.xlu0 %v1564_v21  ;;  %2340 = vpow2.f32 %v1100_v23 }
 0x945   : > { %2342 = vpow2.f32 %v1413_v24  ;;  %v3448_v24 = vld [vmem:[#allocation17] ss:$0 sm:$0xff] }
 0x94b   : > { %v2339_v29 = vpop.eup %2338 }
 0x94e   : > { %v2341_v33 = vpop.eup %2340 }
 0x94f   : > { %v2343_v41 = vpop.eup %2342 }
 0x955   : > { %1264 = vrot.lane.b32.xlu1 %v3335_v1, %s2823_s1 }
 0x959   : > { %1576 = vrot.lane.b32.xlu1 %v3335_v1, %s2821_s30 }
 0x95a   : > { %1420 = vrot.lane.b32.xlu0 %v3335_v1, %s2824_s28 }
 0x9cc   : > { %v1253_v25 = vpop.xlane.xlu0 %1252 }
 0x9cd   : > { %v1254_v26 = vand.u32 2147483647, %v1253_v25  ;;  %v1097_v28 = vpop.xlane.xlu1 %1096 }
 0x9ce   : > { %v1098_v30 = vand.u32 2147483647, %v1097_v28 }
 0x9cf   : > { %v1258_v36 = vmax.f32 %v1254_v26, %v2339_v29 }
 0x9d0   : > { %v1102_v35 = vmax.f32 %v1098_v30, %v2341_v33 }
 0x9d1   : > { %v1410_v1 = vpop.xlane.xlu1 %1409  ;;  %v1259_v39 = vadd.f32 1e-06, %v1258_v36  ;;  %v1566_v43 = vpop.xlane.xlu0 %1565 }
 0x9d2   : > { %v1103_v38 = vadd.f32 1e-06, %v1102_v35  ;;  %v1411_v40 = vand.u32 2147483647, %v1410_v1  ;;  %v1567_v44 = vand.u32 2147483647, %v1566_v43 }
 0x9d4   : > { %2344 = vrcp.f32 %v1103_v38  ;;  %v1415_v42 = vmax.f32 %v1411_v40, %v2343_v41 }
 0x9d5   : > { %2346 = vpow2.f32 %v1569_v37  ;;  %v1265_v32 = vpop.permute.xlu1 %1264  ;;  %v1421_v54 = vpop.permute.xlu0 %1420 }
 0x9d6   : > { %2348 = vrcp.f32 %v1259_v39  ;;  %v1416_v31 = vadd.f32 1e-06, %v1415_v42  ;;  %v1270_v51 = vsel %vm1111_vm6, %v1265_v32, 0  ;;  %v1426_v57 = vsel %vm1111_vm6, %v1421_v54, 0 }
 0x9d8   : > { %2350 = vrcp.f32 %v1416_v31 }
 0x9d9   : > { %v1577_v59 = vpop.permute.xlu1 %1576 }
 0x9da   : > { %v1582_v0 = vsel %vm1111_vm6, %v1577_v59, 0 }
 0x9de   : > { %v2345_v45 = vpop.eup %2344 }
 0x9df   : > { %v2347_v46 = vpop.eup %2346  ;;  %v1105_v47 = vmul.f32 %v2345_v45, %v1094_v15 }
 0x9e0   : > { %v1571_v48 = vmax.f32 %v1567_v44, %v2347_v46  ;;  %v2349_v50 = vpop.eup %2348  ;;  %v1657_v46 = vsub.f32 0.0, %v3310_v34 }
 0x9e1   : > { %v1106_v49 = vpack.c.bf16 %v1105_v47, %v1105_v47  ;;  %v1261_v53 = vmul.f32 %v2349_v50, %v3404_v11 }
 0x9e2   : > { %v1572_v52 = vadd.f32 1e-06, %v1571_v48  ;;  %v2351_v56 = vpop.eup %2350 }
 0x9e3   : > { %2066 = vmatmul.mubr.msk.bf16.vlgmr.msra.gmra.mrb[8].mxu0 %vm1034_vm10, %v1106_v49  ;;  %v1262_v55 = vpack.c.bf16 %v1261_v53, %v1261_v53  ;;  %v1418_v58 = vmul.f32 %v2351_v56, %v3411_v18  ;;  %v1658_v49 = vmul.f32 1.442695, %v1657_v46 }
 0x9e4   : > { %2076 = vmatpush3.bf16.msra.mxu0 %v1270_v51  ;;  %2077 = vmatprep.mubr.msk.bf16.mxu0 %vm2814_vm1, %v2813_v8  ;;  %2352 = vrcp.f32 %v1572_v52 }
 0x9e5   : > { %2087 = vmatprep.subr.bf16.mxu0 %v2813_v8  ;;  %v1419_v61 = vpack.c.bf16 %v1418_v58, %v1418_v58 }
 0x9eb   : > { %2078 = vmatmul.mubr.msk.bf16.vlgmr.msra.gmra.mrb[12].mxu0 %vm1034_vm10, %v1262_v55  ;;  %v2316_v55 = vld [vmem:[#allocation20] sm:$0xff]  }
 0x9ec   : > { %2088 = vmatpush3.bf16.msra.mxu0 %v1426_v57  ;;  %2089 = vmatprep.mubr.msk.bf16.mxu0 %vm2814_vm1, %v2813_v8 }
 0x9ed   : > { %2099 = vmatprep.subr.bf16.mxu0 %v2813_v8  ;;  %2106 = vmatpush3.bf16.msra.mxu1 %v2316_v55 }
 0x9ee   : > { %v2353_v63 = vpop.eup %2352  ;;  %2107 = vmatprep.subr.bf16.mxu1 %v2813_v8 }
 0x9ef   : > { %v1574_v3 = vmul.f32 %v2353_v63, %v3416_v2 }
 0x9f1   : > { %v1575_v4 = vpack.c.bf16 %v1574_v3, %v1574_v3 }
 0x9f3   : > { %2090 = vmatmul.mubr.msk.bf16.vlgmr.msra.gmra.mrb[16].mxu0 %vm1034_vm10, %v1419_v61 }
 0x9f4   : > { %2100 = vmatpush3.bf16.msra.mxu0 %v1582_v0  ;;  %2101 = vmatprep.mubr.msk.bf16.mxu0 %vm2814_vm1, %v2813_v8 }
 0x9fb   : > { %2102 = vmatmul.mubr.msk.bf16.vlgmr.msra.gmra.mrb[20].mxu0 %vm1034_vm10, %v1575_v4 }
 0xab6   : > { %v1149_v5 = vpop.f32.mrb[8].mxu0 }
 0xab7   : > { %v2067_v6 = vpop.f32.mrb[9].mxu0  ;;  %v1155_v17 = vsel %vm1047_vm8, %v1149_v5, 0.0 }
 0xab8   : > { %v1152_v9 = vpop.f32.mrb[10].mxu0 }
 0xab9   : > { %v2068_v10 = vpop.f32.mrb[11].mxu0 }
 0xaba   : > { %v2318_v10 = vld [vmem:[#allocation20 + $0x10] sm:$0xff]  }
 0xabe   : > { %v1306_v11 = vpop.f32.mrb[12].mxu0 }
 0xabf   : > { %v2079_v13 = vpop.f32.mrb[13].mxu0  ;;  %v1312_v14 = vsel %vm1047_vm8, %v1306_v11, 0.0 }
 0xac0   : > { %1313 = vadd.xlane.f32.xlu1 %v1312_v14  ;;  %v1309_v15 = vpop.f32.mrb[14].mxu0 }
 0xac1   : > { %v2080_v16 = vpop.f32.mrb[15].mxu0 }
 0xac2   : > { %v2319_v16 = vld [vmem:[#allocation20 + $0x18] sm:$0xff]  }
 0xac4   : > { %1156 = vadd.xlane.f32.xlu1 %v1155_v17 }
 0xac6   : > { %v1462_v18 = vpop.f32.mrb[16].mxu0 }
 0xac7   : > { %v2091_v19 = vpop.f32.mrb[17].mxu0  ;;  %v1468_v20 = vsel %vm1047_vm8, %v1462_v18, 0.0 }
 0xac8   : > { %1469 = vadd.xlane.f32.xlu0 %v1468_v20  ;;  %v1465_v2 = vpop.f32.mrb[18].mxu0 }
 0xac9   : > { %v2092_v21 = vpop.f32.mrb[19].mxu0 }
 0xace   : > { %v1618_v60 = vpop.f32.mrb[20].mxu0 }
 0xacf   : > { %v2103_v7 = vpop.f32.mrb[21].mxu0  ;;  %v1624_v22 = vsel %vm1047_vm8, %v1618_v60, 0.0 }
 0xad0   : > { %1625 = vadd.xlane.f32.xlu0 %v1624_v22  ;;  %v1621_v23 = vpop.f32.mrb[22].mxu0 }
 0xad1   : > { %v2104_v12 = vpop.f32.mrb[23].mxu0  ;;  %v1998_v23 = vld [vmem:[#allocation18] ss:$0 sm:$0xff] }
 0xad2   : > { %v1655_v12 = vmul.f32 %v1998_v23, %v3328_v62 }
 0xad5   : > { %1325 = vrot.lane.b32.xlu1 %v3448_v24, %s2823_s1 }
 0xb4d   : > { %v1314_v25 = vpop.xlane.xlu1 %1313 }
 0xb4e   : > { %v1315_v26 = vmul.f32 0.0625, %v1314_v25 }
 0xb50   : > { %v1316_v27 = vsub.f32 %v1306_v11, %v1315_v26 }
 0xb51   : > { %v1157_v42 = vpop.xlane.xlu1 %1156 }
 0xb52   : > { %v1317_v28 = vmul.f32 %v1316_v27, %v1316_v27  ;;  %v1159_v43 = vmul.f32 0.0625, %v1157_v42 }
 0xb54   : > { %v1318_v29 = vsel %vm1047_vm8, %v1317_v28, 0.0  ;;  %v1160_v31 = vsub.f32 %v1149_v5, %v1159_v43  ;;  %v2317_v5 = vld [vmem:[#allocation20 + $0x8] sm:$0xff]  }
 0xb55   : > { %v1470_v30 = vpop.xlane.xlu0 %1469  ;;  %1319 = vadd.xlane.f32.xlu0 %v1318_v29  ;;  %v1326_v50 = vpop.permute.xlu1 %1325  ;;  %2108 = vmatpush3.bf16.msra.mxu1 %v2317_v5 }
 0xb56   : > { %v1471_v33 = vmul.f32 0.0625, %v1470_v30  ;;  %v1161_v44 = vmul.f32 %v1160_v31, %v1160_v31  ;;  %2109 = vmatprep.subr.bf16.mxu1 %v2813_v8  ;;  %v2366_v30 = vld [vmem:[%s3261_s17] sm:$0xff]  ;;  %s2829_s17 = smov [#allocation23]  }
 0xb57   : > { %s2709_s1 = sshll.u32 %s2829_s17, 4  ;;  %s2710_s1 = int_to_ptr.vmem [resolvable:$false] %s2709_s1 }
 0xb58   : > { %v1472_v35 = vsub.f32 %v1462_v18, %v1471_v33  ;;  %v1162_v45 = vsel %vm1047_vm8, %v1161_v44, 0.0  ;;  %p2712_p12 = scmp.lt.s32.totalorder %s3482_s25, %s2710_s1 }
 0xb59   : > { %2110 = vmatpush3.bf16.msra.mxu1 %v2318_v10 }
 0xb5a   : > { %v1473_v36 = vmul.f32 %v1472_v35, %v1472_v35  ;;  %2111 = vmatprep.subr.bf16.mxu1 %v2813_v8 }
 0xb5c   : > { %v1474_v37 = vsel %vm1047_vm8, %v1473_v36, 0.0 }
 0xb5d   : > { %1475 = vadd.xlane.f32.xlu1 %v1474_v37  ;;  %v1626_v1 = vpop.xlane.xlu0 %1625  ;;  %2112 = vmatpush3.bf16.msra.mxu1 %v2319_v16 }
 0xb5e   : > { %v1627_v38 = vmul.f32 0.0625, %v1626_v1 }
 0xb60   : > { %v1628_v39 = vsub.f32 %v1618_v60, %v1627_v38 }
 0xb62   : > { %v1629_v40 = vmul.f32 %v1628_v39, %v1628_v39 }
 0xb64   : > { %v1630_v41 = vsel %vm1047_vm8, %v1629_v40, 0.0 }
 0xb65   : > { %1631 = vadd.xlane.f32.xlu0 %v1630_v41 }
 0xb6e   : > { %1637 = vrot.lane.b32.xlu1 %v3448_v24, %s2821_s30  ;;  %s3580_s30 = sld [smem:[#allocation37_spill]] }
 0xb7b   : > { %1481 = vrot.lane.b32.xlu0 %v3448_v24, %s2824_s28  ;;  %s2711_s28 = scalar_lea.vmem %s2710_s1, 256 }
 0xb92   : > { %1163 = vadd.xlane.f32.xlu1 %v1162_v45 }
 0xbe2   : > { %v1320_v47 = vpop.xlane.xlu0 %1319 }
 0xbe3   : > { %v1321_v48 = vmul.f32 0.0625, %v1320_v47 }
 0xbe5   : > { %v1322_v32 = vadd.f32 1e-05, %v1321_v48 }
 0xbe7   : > { %2354 = vrsqrt.f32 %v1322_v32 }
 0xbe8   : > { %2356 = vpow2.f32 %v1658_v49 }
 0xbea   : > { %v1476_v51 = vpop.xlane.xlu1 %1475 }
 0xbeb   : > { %v1477_v52 = vmul.f32 0.0625, %v1476_v51 }
 0xbed   : > { %v1478_v53 = vadd.f32 1e-05, %v1477_v52 }
 0xbee   : > { %v1638_v13 = vpop.permute.xlu1 %1637 }
 0xbef   : > { %2358 = vrsqrt.f32 %v1478_v53 }
 0xbf1   : > { %v2355_v54 = vpop.eup %2354 }
 0xbf2   : > { %v1632_v56 = vpop.xlane.xlu0 %1631  ;;  %v1324_v57 = vmul.f32 %v2355_v54, %v1316_v27  ;;  %v2357_v59 = vpop.eup %2356 }
 0xbf3   : > { %v1633_v58 = vmul.f32 0.0625, %v1632_v56  ;;  %v1660_v0 = vadd.f32 1.0, %v2357_v59 }
 0xbf4   : > { %v1328_v61 = vmul.f32 %v1326_v50, %v1324_v57 }
 0xbf5   : > { %v1634_v63 = vadd.f32 1e-05, %v1633_v58 }
 0xbf6   : > { %1330 = vrot.lane.b32.xlu0 %v1328_v61, %s2820_s14  ;;  %v1482_v4 = vpop.permute.xlu0 %1481 }
 0xbf7   : > { %2360 = vrsqrt.f32 %v1634_v63 }
 0xbf8   : > { %2362 = vrcp.f32 %v1660_v0 }
 0xbf9   : > { %v2359_v3 = vpop.eup %2358 }
 0xbfa   : > { %v1480_v6 = vmul.f32 %v2359_v3, %v1472_v35 }
 0xbfc   : > { %v1484_v9 = vmul.f32 %v1482_v4, %v1480_v6 }
 0xbfe   : > { %1486 = vrot.lane.b32.xlu0 %v1484_v9, %s2819_s20 }
 0xc01   : > { %v2361_v11 = vpop.eup %2360 }
 0xc02   : > { %v1636_v14 = vmul.f32 %v2361_v11, %v1628_v39  ;;  %v2363_v17 = vpop.eup %2362 }
 0xc03   : > { %v1662_v18 = vmul.f32 %v2363_v17, %v3310_v34 }
 0xc04   : > { %v1640_v15 = vmul.f32 %v1638_v13, %v1636_v14 }
 0xc06   : > { %1642 = vrot.lane.b32.xlu0 %v1640_v15, %s2822_s0 }
 0xc0a   : > { %1664 = vrot.lane.b32.xlu0 %v1662_v18, %s2816_s16  ;;  %s2005_s16 = sshll.u32 %s3567_s29, 7  ;;  %s2705_s29 = scalar_lea.vmem %s3482_s25, 128 }
 0xc0b   : > { %s3480_s0 = scalar_lea.hbm %s3580_s30, %s2005_s16  ;;  %p2706_p2 = scmp.ne.s32.totalorder %s3482_s25, %s2705_s29 }
 0xc0c   : > { %p2713_p8 = scmp.lt.s32.totalorder %s2711_s28, %s2705_s29 }
 0xc0d   : > { %p2707_p6 = pnand %p2706_p2, %p3581_p0 }
 0xc0e   : > { %p2714_p5 = por %p2713_p8, %p2712_p12 }
 0xc0f   : > { %p2708_p11 = pneg %p2707_p6 }
 0xc11   : > { %p2715_p9 = pnand %p2714_p5, %p2708_p11 }
 0xc1f   : > { %v1164_v19 = vpop.xlane.xlu1 %1163 }
 0xc20   : > { %v1165_v20 = vmul.f32 0.0625, %v1164_v19 }
 0xc22   : > { %v1166_v2 = vadd.f32 1e-05, %v1165_v20 }
 0xc24   : > { %2364 = vrsqrt.f32 %v1166_v2 }
 0xc2e   : > { %v2365_v21 = vpop.eup %2364 }
 0xc2f   : > { %v1168_v60 = vmul.f32 %v2365_v21, %v1160_v31 }
 0xc31   : > { %v1175_v7 = vmul.f32 %v3448_v24, %v1168_v60 }
 0xc33   : > { %1176 = vst.msk [vmem:[#allocation2] sm:$0xff] %vm1047_vm8, %v1175_v7 }
 0xc68   : > { %v1331_v8 = vpop.permute.xlu0 %1330 }
 0xc69   : > { %1334 = vst.msk [vmem:[#allocation2] sm:$0xff] %vm1333_vm11, %v1331_v8 }
 0xc70   : > { %v1487_v22 = vpop.permute.xlu0 %1486 }
 0xc71   : > { %1490 = vst.msk [vmem:[#allocation2] sm:$0xff] %vm1489_vm12, %v1487_v22 }
 0xc78   : > { %v1643_v34 = vpop.permute.xlu0 %1642 }
 0xc79   : > { %1646 = vst.msk [vmem:[#allocation2] sm:$0xff] %vm1645_vm13, %v1643_v34 }
 0xc7c   : > { %v1665_v24 = vpop.permute.xlu0 %1664 }
 0xc80   : > { %v1647_v25 = vld [vmem:[#allocation2] sm:$0xff] }
 0xc81   : > { %v1656_v26 = vadd.f32 %v1655_v12, %v1647_v25 }
 0xc83   : > { %v1667_v27 = vmul.f32 %v1665_v24, %v1656_v26 }
 0xc85   : > { %v1668_v28 = vpack.c.bf16 %v1667_v27, %v1667_v27 }
 0xc87   : > { %2114 = vmatmul.mubr.msk.bf16.vlgmr.msra.gmra.mrb[20].mxu1 %vm767_vm3, %v1668_v28 }
 0xd5a   : > { %v1738_v29 = vpop.f32.mrb[20].mxu1 }
 0xd5b   : > { %v1744_v33 = vadd.f32 %v2366_v30, %v1738_v29  ;;  %v2115_v35 = vpop.f32.mrb[21].mxu1 }
 0xd5c   : > { %v1741_v62 = vpop.f32.mrb[22].mxu1 }
 0xd5d   : > { %v2116_v36 = vpop.f32.mrb[23].mxu1  ;;  %1745 = vst.msk [vmem:[%s574_s18] sm:$0xff] %vm578_vm0, %v1744_v33 }
 0xd5e   : > { %2718 = shalt.err (!%p2715_p9)
}
 0xd5f   : > { %s2719_s27 = scalar_lea.hbm %s3480_s0, 128  ;;  %s2723_s20 = scalar_lea.hbm %s3580_s30, 256 }
 0xd60   : > { %p2720_p7 = scmp.ne.s32.totalorder %s3480_s0, %s2719_s27  ;;  %p2724_p13 = scmp.lt.u32.totalorder %s3480_s0, %s3580_s30 }
 0xd61   : > { %p2725_p1 = scmp.lt.u32.totalorder %s2723_s20, %s2719_s27  ;;  %p2727_p2 = scmp.lt.u32.totalorder %s2719_s27, %s3480_s0 }
 0xd62   : > { %p2721_p10 = pnand %p2720_p7, %p3581_p0 }
 0xd63   : > { %p2726_p3 = por %p2725_p1, %p2724_p13 }
 0xd64   : > { %p2722_p4 = pneg %p2721_p10 }
 0xd65   : > { %p2728_p6 = por %p2727_p2, %p2726_p3 }
 0xd67   : > { %p2729_p11 = pnand %p2728_p6, %p2722_p4 }
 0xd69   : > { %2732 = shalt.err (!%p2729_p11)
}
 0xd6a   : > { %2163 = dma.vmem_to_hbm [thread:$0]  (%p3581_p0), %s3482_s25, 128, %s3480_s0, %s1747_s12  }
 0xd6b PF: > { %s1772_s29 = sand.u32 1, %s2783_s21   ;;  %p3582_p12 = scmp.ne.s32.totalorder %s3562_s3, 0 }
 0xd6c   : > { %p3583_p8 = scmp.ge.s32.totalorder %s2795_s24, 2  ;;  %s1773_s1 = scalar_lea.sflag [#allocation5], %s1772_s29 }
 0xd6e   : > { %p2204_p5 = pnand %p3583_p8, %p3582_p12 }
 0xd70   : > { %2778 = dma.done.wait (!%p2204_p5), %s1773_s1, 128  }
 0xd71   : > { %2780 = vsyncadd (!%p2204_p5), %s1773_s1, 4294967168  ;;  %p31_p9 = scmp.ge.s32.totalorder %s3185_s15, 4   ;;  %s3584_s21 = smov %s2787_s22 }
 0xd72   : > { %s3585_s22 = smov %s2791_s23  ;;  %s3586_s23 = smov %s3197_s26 }
 0xd73   : > { %s3587_s24 = smov %s3185_s15  ;;  %33 = sbr.rel (!%p31_p9) target bundleno = 16 (0x10), region = 157 }
 0xd7a   :  { %1778 = vsyncpa [#allocation4], 1 }
 0xd7b   :  { %1780 = vsyncpa [#allocation4 + $0x1], 1 }
 0xd7c   :  { %1781 = vsyncpa [#allocation7], 1 }
 0xd7d   :  { %1782 = vsyncpa [#allocation10], 1 }
 0xd7e   :  { %1783 = vsyncpa [#allocation13], 1 }
 0xd7f   :  { %1784 = vsyncpa [#allocation16], 1 }
 0xd80   :  { %1785 = vsyncpa [#allocation19], 1 }
 0xd81   :  { %1786 = vsyncpa [#allocation22], 1 }
 0xd82   :  { %1787 = vsyncpa [#allocation5], 1 }
 0xd83   :  { %1789 = vsyncpa [#allocation5 + $0x1], 1 }

</bundles_post_ra>
